<compile_context>
chip_gen: v6e
topology: v6e:2x2x1
jax: 0.10.0
libtpu: 0.0.40
codegen_flags: <defaults>
</compile_context>

<pallas_src>
import functools

import jax
import jax.numpy as jnp
from jax.experimental import pallas as pl
from jax.experimental.pallas import tpu as pltpu

NC = 3     # output image channels (as in the PyTorch module)
NGF = 8    # scaled-down ngf (PyTorch uses 64)
NZ = 16    # scaled-down nz  (PyTorch uses 100)

BN_EPS = 1e-5


def _round_up(x, m):
    return (x + m - 1) // m * m


# --------------------------- hardware-aware tiling ---------------------------

def _num_tensorcores():
    """TensorCores per chip.  v7x has 2 (wants >= 2 parallel grid steps);
    v5e/v6e have 1, where splitting the grid is pure per-step overhead
    (review).  Queried defensively; defaults to 1 (whole-M tiles)."""
    try:
        info = pltpu.get_tpu_info()
        for name in ("num_cores", "core_count", "num_tensorcores",
                     "tensor_cores_per_chip", "num_tensor_cores"):
            v = getattr(info, name, None)
            if isinstance(v, int) and 0 < v <= 8:
                return v
    except Exception:
        pass
    try:
        if "v7" in jax.devices()[0].device_kind.lower():
            return 2
    except Exception:
        pass
    return 1


def _choose_tm(M, Kp, Np, n_cores):
    """Whole-M tiles on 1-TC chips; split the parallel M axis in two on
    multi-TC chips once M is large enough so both cores get work.  A VMEM
    guard keeps double-buffered tiles + the resident weight block under a
    conservative budget (v7x only has 64 MiB physical VMEM)."""
    tm = M
    if n_cores > 1 and M >= 256 and M % 16 == 0:
        tm = M // 2
    budget = 24 << 20

    def vmem_bytes(t):
        return (2 * t * Kp * 2                      # double-buffered bf16 LHS
                + 2 * (t * Np * 2 + 8 * Np * 4)     # bf16 y + f32 stats tiles
                + 2 * Kp * Np * 2)                  # resident bf16 weight

    while vmem_bytes(tm) > budget and tm % 16 == 0 and tm > 16:
        tm //= 2
    return tm


def _choose_fold(H, W, IC, OC):
    """Width fold F (a divisor of the input width W).

    F packs F consecutive output-column pairs into the matmul N axis so the
    real column count F*4*OC reaches the 128-lane width instead of being zero
    padded (review: MXU N utilization).  K grows to 3*(F+2)*IC, so F is
    chosen to minimize the padded MXU volume M*Kp*Np; at full DCGAN widths
    (4*OC >= 256) this returns 1."""
    best_f, best_vol = 1, None
    for f in range(1, W + 1):
        if W % f:
            continue
        vol = ((H * W) // f) * _round_up(3 * (f + 2) * IC, 128) \
            * _round_up(4 * f * OC, 128)
        if best_vol is None or vol < best_vol or (vol == best_vol and f > best_f):
            best_f, best_vol = f, vol
    return best_f


# --------------------------- Pallas kernels ---------------------------------

def _matmul_ssq_kernel(x_ref, w_ref, y_ref, ssq_ref):
    """(tm, K) @ (K, N) on the MXU (bf16 in, f32 accumulate), bf16 store.

    The epilogue also writes this tile's per-column sum of squares into row 0
    of the stats block, so BatchNorm's batch variance never needs an extra
    HBM pass over y.  The per-column sum (for the mean) is computed in XLA as
    colsum(x) @ w (review: keep only the square-sum reduce in the epilogue).
    Rows 1..7 of the stats block are neither written nor read downstream.
    """
    acc = jnp.dot(x_ref[...], w_ref[...], preferred_element_type=jnp.float32)
    y_ref[...] = acc.astype(y_ref.dtype)
    ssq_ref[0:1, :] = jnp.sum(acc * acc, axis=0, keepdims=True)


def _matmul_tanh_kernel(x_ref, w_ref, y_ref):
    """Last layer (no BN): matmul with tanh fused in the epilogue (EUP)."""
    acc = jnp.dot(x_ref[...], w_ref[...], preferred_element_type=jnp.float32)
    y_ref[...] = jnp.tanh(acc)


def matmul_bn_ssq(x, w, tm):
    """x (M, K) bf16, w (K, N) bf16 -> (y bf16 (M, N), ssq f32 (gm*8, N))."""
    M, K = x.shape
    _, N = w.shape
    gm = M // tm
    cost = pl.CostEstimate(
        flops=2 * M * K * N + 2 * M * N,
        transcendentals=0,
        bytes_accessed=(M * K + K * N + M * N) * 2 + gm * 8 * N * 4)
    return pl.pallas_call(
        _matmul_ssq_kernel,
        out_shape=(jax.ShapeDtypeStruct((M, N), jnp.bfloat16),
                   jax.ShapeDtypeStruct((gm * 8, N), jnp.float32)),
        grid_spec=pltpu.PrefetchScalarGridSpec(
            num_scalar_prefetch=0,
            grid=(gm,),
            in_specs=[pl.BlockSpec((tm, K), lambda i: (i, 0)),
                      pl.BlockSpec((K, N), lambda i: (0, 0))],
            out_specs=(pl.BlockSpec((tm, N), lambda i: (i, 0)),
                       pl.BlockSpec((8, N), lambda i: (i, 0))),
        ),
        compiler_params=pltpu.CompilerParams(
            dimension_semantics=("parallel",)),
        cost_estimate=cost,
    )(x, w)


def matmul_tanh(x, w, tm):
    """x (M, K) bf16, w (K, N) bf16 -> tanh(x @ w) f32 (M, N), one call."""
    M, K = x.shape
    _, N = w.shape
    cost = pl.CostEstimate(
        flops=2 * M * K * N,
        transcendentals=M * N,
        bytes_accessed=(M * K + K * N) * 2 + M * N * 4)
    return pl.pallas_call(
        _matmul_tanh_kernel,
        out_shape=jax.ShapeDtypeStruct((M, N), jnp.float32),
        grid_spec=pltpu.PrefetchScalarGridSpec(
            num_scalar_prefetch=0,
            grid=(M // tm,),
            in_specs=[pl.BlockSpec((tm, K), lambda i: (i, 0)),
                      pl.BlockSpec((K, N), lambda i: (0, 0))],
            out_specs=pl.BlockSpec((tm, N), lambda i: (i, 0)),
        ),
        compiler_params=pltpu.CompilerParams(
            dimension_semantics=("parallel",)),
        cost_estimate=cost,
    )(x, w)


# --------------------------- layout glue (indexing only) --------------------

# Sub-pixel decomposition of ConvTranspose2d(k=4, stride=2, pad=1):
# output row parity py uses kernel rows _KMAP[py][dy] for input offset dy.
_KMAP = ((3, 1), (2, 0))


def _packed_weight(w_t, F):
    """(IC, OC, 4, 4) ConvTranspose2d weight -> (3*(F+2)*IC, F*4*OC) matrix.

    Rows: (ty, u, ic) taps over the 3 x (F+2) window of the 1-padded input;
    columns: (f, py, px, oc) - F output-column pairs x 4 parity phases."""
    IC, OC = w_t.shape[0], w_t.shape[1]
    wb = jnp.zeros((3, 3, IC, 2, 2, OC), w_t.dtype)          # F=1 core
    for py in range(2):
        for px in range(2):
            for dy in range(2):
                for dx in range(2):
                    ky, kx = _KMAP[py][dy], _KMAP[px][dx]
                    wb = wb.at[py + dy, px + dx, :, py, px, :].set(
                        w_t[:, :, ky, kx])
    # width-F packing: packed output column f uses input-column taps u=f..f+2
    wf = jnp.zeros((3, F + 2, IC, F, 2, 2, OC), w_t.dtype)
    for f in range(F):
        wf = wf.at[:, f:f + 3, :, f, :, :, :].set(wb)
    return wf.reshape(3 * (F + 2) * IC, F * 4 * OC)


def _packed_im2col(act_nhwc, F):
    """(B, H, W, IC) -> (B*H*(W/F), 3*(F+2)*IC) bf16 im2col matrix.

    Rows are groups of F consecutive output-column pairs; columns are the
    (ty, u, ic) taps of the 3 x (F+2) window of the 1-padded input those F
    outputs touch.  Only the real taps are materialized (no zero dilation)."""
    B, H, W, IC = act_nhwc.shape
    G = W // F
    xp = jnp.pad(act_nhwc, ((0, 0), (1, 1), (1, 1), (0, 0)))
    taps = []
    for ty in range(3):
        for u in range(F + 2):
            # padded input columns g*F + u for g in [0, G)
            taps.append(xp[:, ty:ty + H, u:u + (G - 1) * F + 1:F, :])
    cols = jnp.stack(taps, axis=3)                     # (B, H, G, 3*(F+2), IC)
    return cols.reshape(B * H * G, 3 * (F + 2) * IC).astype(jnp.bfloat16)


def _unpack_phases(y, B, H, W, F, OC):
    """(B*H*(W/F), F*4*OC) phase-major columns -> NHWC (B, 2H, 2W, OC)."""
    G = W // F
    y = y.reshape(B, H, G, F, 2, 2, OC)                # (b, m, g, f, py, px, oc)
    y = jnp.transpose(y, (0, 1, 4, 2, 3, 5, 6))        # (b, m, py, g, f, px, oc)
    return y.reshape(B, 2 * H, 2 * W, OC)


# --------------------------- layers ------------------------------------------

def first_layer_xla(x_latent, lp):
    """ConvTranspose2d(nz, 8*ngf, 4, 1, 0) on a 1x1 input + BN + ReLU.

    This is exactly a (B, nz) x (nz, 16*OC) matmul with M == batch (2), which
    would waste a pallas_call on 2/8 sublanes and a sliver of the MXU, so it
    runs as plain XLA (review item)."""
    w_mat = lp["w_mat"]                                # (nz, 16*OC) f32
    gamma, beta = lp["bn"]
    OC = gamma.shape[0]
    B = x_latent.shape[0]
    y = jnp.dot(x_latent, w_mat,
                precision=jax.lax.Precision.HIGHEST).reshape(B * 16, OC)
    mean = y.mean(axis=0)
    var = jnp.maximum((y * y).mean(axis=0) - mean * mean, 0.0)
    scale = gamma * jax.lax.rsqrt(var + BN_EPS)
    shift = beta - mean * scale
    a = jnp.maximum(y * scale + shift, 0.0)
    return a.reshape(B, 4, 4, OC).astype(jnp.bfloat16)


def conv_t_bn_relu(act, lp, n_cores):
    """ConvTranspose2d(IC, OC, 4, 2, 1) + BatchNorm (batch stats) + ReLU.

    One fused Pallas matmul (bf16 y + per-tile sum of squares); BN affine,
    ReLU and phase un-packing run as XLA glue fused around the kernel
    (review: drop the separate affine_relu pallas_call, bf16 activations)."""
    B, H, W, _ = act.shape
    F, OC, n_real = lp["F"], lp["oc"], lp["n_real"]
    w_p = lp["w_p"]                                    # (Kp, Np) bf16
    gamma, beta = lp["bn"]

    x_col = _packed_im2col(act, F)                     # (M, K) bf16
    x_p = jnp.pad(x_col, ((0, 0), (0, w_p.shape[0] - x_col.shape[1])))
    M = x_p.shape[0]

    tm = _choose_tm(M, w_p.shape[0], w_p.shape[1], n_cores)
    y, ssq = matmul_bn_ssq(x_p, w_p, tm)               # bf16 (M,Np), f32 stats

    # BatchNorm batch statistics: mean via a (1,K)x(K,N) matvec on colsum(x)
    # (XLA), variance from the kernel-emitted sum of squares.
    s1 = jnp.dot(jnp.sum(x_p, axis=0, dtype=jnp.float32),
                 w_p.astype(jnp.float32),
                 precision=jax.lax.Precision.HIGHEST)            # (Np,)
    s2 = ssq.reshape(-1, 8, ssq.shape[-1])[:, 0, :].sum(axis=0)  # (Np,)
    count = B * (2 * H) * (2 * W)
    mean = s1[:n_real].reshape(-1, OC).sum(axis=0) / count
    msq = s2[:n_real].reshape(-1, OC).sum(axis=0) / count
    var = jnp.maximum(msq - mean * mean, 0.0)          # biased, training-mode
    scale = gamma * jax.lax.rsqrt(var + BN_EPS)
    shift = beta - mean * scale

    nrep = n_real // OC                                # = F * 4
    a = y[:, :n_real].astype(jnp.float32) * jnp.tile(scale, nrep) \
        + jnp.tile(shift, nrep)
    a = jnp.maximum(a, 0.0).astype(jnp.bfloat16)
    return _unpack_phases(a, B, H, W, F, OC)


def conv_t_tanh(act, lp, n_cores):
    """Final ConvTranspose2d(IC, NC, 4, 2, 1) + tanh, fully fused (one call)."""
    B, H, W, _ = act.shape
    F, OC, n_real = lp["F"], lp["oc"], lp["n_real"]
    w_p = lp["w_p"]
    x_col = _packed_im2col(act, F)
    x_p = jnp.pad(x_col, ((0, 0), (0, w_p.shape[0] - x_col.shape[1])))
    tm = _choose_tm(x_p.shape[0], w_p.shape[0], w_p.shape[1], n_cores)
    y = matmul_tanh(x_p, w_p, tm)                      # tanh fused in epilogue
    return _unpack_phases(y[:, :n_real], B, H, W, F, OC)


# --------------------------- Generator ---------------------------------------

def init_generator_params(key):
    specs = [
        (NZ,      NGF * 8, 4, 1, 0),
        (NGF * 8, NGF * 4, 4, 2, 1),
        (NGF * 4, NGF * 2, 4, 2, 1),
        (NGF * 2, NGF,     4, 2, 1),
        (NGF,     NC,      4, 2, 1),
    ]
    params = []
    for i, (ic, oc, k, s, p) in enumerate(specs):
        key, wk, gk, bk = jax.random.split(key, 4)
        w = 0.02 * jax.random.normal(wk, (ic, oc, k, k), jnp.float32)
        if i < len(specs) - 1:   # all but last layer have BatchNorm
            gamma = 1.0 + 0.02 * jax.random.normal(gk, (oc,), jnp.float32)
            beta = 0.02 * jax.random.normal(bk, (oc,), jnp.float32)
            bn = (gamma, beta)
        else:
            bn = None
        params.append(dict(w=w, stride=s, pad=p, bn=bn))
    return params


def pack_generator_params(params):
    """One-time weight packing: sub-pixel + width-fold matrices, padded to
    lane-dense 128 multiples and cast to bf16 (outside the hot path)."""
    packed = []
    w0 = params[0]["w"]
    w0_mat = jnp.transpose(w0, (0, 2, 3, 1)).reshape(w0.shape[0], -1)
    packed.append(dict(w_mat=w0_mat, bn=params[0]["bn"]))
    H = W = 4                                          # first stride-2 input
    for layer in params[1:]:
        w_t = layer["w"]
        IC, OC = w_t.shape[0], w_t.shape[1]
        F = _choose_fold(H, W, IC, OC)
        w_mat = _packed_weight(w_t, F)
        K, n_real = w_mat.shape
        Kp, Np = _round_up(K, 128), _round_up(n_real, 128)
        w_p = jnp.pad(w_mat, ((0, Kp - K), (0, Np - n_real))).astype(jnp.bfloat16)
        packed.append(dict(w_p=w_p, F=F, oc=OC, n_real=n_real, bn=layer["bn"]))
        H, W = 2 * H, 2 * W
    return packed


def generator_forward(packed, n_cores, x_nchw):
    # NCHW (PyTorch) -> NHWC internally; bf16 activations between layers,
    # all matmul accumulation and BN / tanh math in f32.
    x = x_nchw.reshape(x_nchw.shape[0], -1).astype(jnp.float32)   # (B, nz)
    act = first_layer_xla(x, packed[0])
    for lp in packed[1:-1]:
        act = conv_t_bn_relu(act, lp, n_cores)
    img = conv_t_tanh(act, packed[-1], n_cores)                   # NHWC f32
    return jnp.transpose(img, (0, 3, 1, 2))                       # NCHW


# --------------------------- pure-XLA reference ------------------------------

def _conv_t_ref(x_nhwc, w_pt, stride, pad):
    """ConvTranspose2d(k, stride, pad, bias=False) as a dilated conv."""
    k = w_pt.shape[2]
    w_hwio = jnp.transpose(jnp.flip(w_pt, (2, 3)), (2, 3, 0, 1))
    return jax.lax.conv_general_dilated(
        x_nhwc, w_hwio, window_strides=(1, 1),
        padding=((k - 1 - pad, k - 1 - pad), (k - 1 - pad, k - 1 - pad)),
        lhs_dilation=(stride, stride),
        dimension_numbers=("NHWC", "HWIO", "NHWC"),
        precision=jax.lax.Precision.HIGHEST)


def generator_reference(params, x_nchw):
    """Pure-XLA reference (f32 convs on bf16-rounded weights / inter-layer
    activations, same training-mode BN) for the numerical self-check."""
    def bf(v):
        return v.astype(jnp.bfloat16).astype(jnp.float32)
    x = jnp.transpose(x_nchw, (0, 2, 3, 1)).astype(jnp.float32)
    for i, layer in enumerate(params):
        w = layer["w"] if i == 0 else bf(layer["w"])
        y = _conv_t_ref(x, w, layer["stride"], layer["pad"])
        if layer["bn"] is not None:
            gamma, beta = layer["bn"]
            yc = y.reshape(-1, y.shape[-1])
            mean = yc.mean(axis=0)
            var = jnp.maximum((yc * yc).mean(axis=0) - mean * mean, 0.0)
            scale = gamma * jax.lax.rsqrt(var + BN_EPS)
            x = bf(jnp.maximum(y * scale + (beta - mean * scale), 0.0))
        else:
            x = jnp.tanh(y)
    return jnp.transpose(x, (0, 3, 1, 2))


if __name__ == "__main__":
    key = jax.random.PRNGKey(0)
    pkey, xkey = jax.random.split(key)
    params = init_generator_params(pkey)
    packed = pack_generator_params(params)
    n_cores = _num_tensorcores()

    B = 2
    x = jax.random.normal(xkey, (B, NZ, 1, 1), jnp.float32)   # latent input

    fwd = jax.jit(functools.partial(generator_forward, packed, n_cores))
    out = jax.block_until_ready(fwd(x))

    assert out.shape == (B, NC, 64, 64), out.shape
    assert bool(jnp.all(jnp.isfinite(out)))
    assert bool(jnp.all(jnp.abs(out) <= 1.0 + 1e-6))   # tanh output range

    # Dev-loop rule: tolerance-assert against a pure-JAX reference.  Loose
    # bounds cover bf16-rounding / accumulation-order differences while still
    # catching any structural (indexing / weight-packing) bug.
    ref_fwd = jax.jit(functools.partial(generator_reference, params))
    ref = jax.block_until_ready(ref_fwd(x))
    diff = jnp.abs(out - ref)
    assert float(diff.max()) < 0.1, ("max diff", float(diff.max()))
    assert float(diff.mean()) < 0.01, ("mean diff", float(diff.mean()))

    print("KERNEL_OK")
</pallas_src>

<mosaic_0001>
module attributes {stable_mosaic.version = 11 : i64} {
  func.func @_matmul_ssq_kernel(%arg0: i32, %arg1: memref<32x640xbf16, #tpu.memory_space<vmem>>, %arg2: memref<640x128xbf16, #tpu.memory_space<vmem>>, %arg3: memref<32x128xbf16, #tpu.memory_space<vmem>>, %arg4: memref<8x128xf32, #tpu.memory_space<vmem>>) attributes {dimension_semantics = [#tpu.dimension_semantics<parallel>], iteration_bounds = array<i64: 1>, scalar_prefetch = 0 : i64, scratch_operands = 0 : i64, tpu.core_type = #tpu.core_type<tc>, window_params = [{transform_indices = @transform_0, window_bounds = array<i64: 32, 640>}, {pipeline_mode = #tpu.pipeline_mode<synchronous>, transform_indices = @transform_1, window_bounds = array<i64: 640, 128>}, {transform_indices = @transform_2, window_bounds = array<i64: 32, 128>}, {transform_indices = @transform_3, window_bounds = array<i64: 8, 128>}]} {
    %c0 = arith.constant 0 : index
    %c0_0 = arith.constant 0 : index
    %0 = vector.load %arg1[%c0, %c0_0] : memref<32x640xbf16, #tpu.memory_space<vmem>>, vector<32x640xbf16>
    %c0_1 = arith.constant 0 : index
    %c0_2 = arith.constant 0 : index
    %1 = vector.load %arg2[%c0_1, %c0_2] : memref<640x128xbf16, #tpu.memory_space<vmem>>, vector<640x128xbf16>
    %cst = arith.constant dense<0.000000e+00> : vector<32x128xf32>
    %2 = tpu.matmul %0, %1, %cst {dimension_numbers = #tpu.dot_dimension_numbers<[1], [0], [0], [1], [0, 0, 1, 1], [], []>} : vector<32x640xbf16>, vector<640x128xbf16>, vector<32x128xf32> -> vector<32x128xf32>
    %3 = arith.truncf %2 : vector<32x128xf32> to vector<32x128xbf16>
    %c0_3 = arith.constant 0 : index
    %c0_4 = arith.constant 0 : index
    %4 = vector.load %arg3[%c0_3, %c0_4] : memref<32x128xbf16, #tpu.memory_space<vmem>>, vector<32x128xbf16>
    tpu.vector_store %arg3[%c0_3, %c0_4], %3 {strides = array<i32>} : memref<32x128xbf16, #tpu.memory_space<vmem>>, vector<32x128xbf16>,
    %5 = arith.mulf %2, %2 : vector<32x128xf32>
    %cst_5 = arith.constant dense<0.000000e+00> : vector<128xf32>
    %6 = vector.multi_reduction <add>, %5, %cst_5 [0] : vector<32x128xf32> to vector<128xf32>
    %7 = vector.shape_cast %6 : vector<128xf32> to vector<1x128xf32>
    %c0_6 = arith.constant 0 : index
    %c0_7 = arith.constant 0 : index
    %8 = vector.load %arg4[%c0_6, %c0_7] : memref<8x128xf32, #tpu.memory_space<vmem>>, vector<1x128xf32>
    tpu.vector_store %arg4[%c0_6, %c0_7], %7 {strides = array<i32>} : memref<8x128xf32, #tpu.memory_space<vmem>>, vector<1x128xf32>,
    return
  }
  func.func @transform_0(%arg0: i32) -> (i32, i32) {
    %c0_i32 = arith.constant 0 : i32
    %c0_i32_0 = arith.constant 0 : i32
    return %arg0, %c0_i32 : i32, i32
  }
  func.func @transform_1(%arg0: i32) -> (i32, i32) {
    %c0_i32 = arith.constant 0 : i32
    %c0_i32_0 = arith.constant 0 : i32
    %c0_i32_1 = arith.constant 0 : i32
    return %c0_i32, %c0_i32_0 : i32, i32
  }
  func.func @transform_2(%arg0: i32) -> (i32, i32) {
    %c0_i32 = arith.constant 0 : i32
    %c0_i32_0 = arith.constant 0 : i32
    return %arg0, %c0_i32 : i32, i32
  }
  func.func @transform_3(%arg0: i32) -> (i32, i32) {
    %c0_i32 = arith.constant 0 : i32
    %c0_i32_0 = arith.constant 0 : i32
    return %arg0, %c0_i32 : i32, i32
  }
}

module attributes {stable_mosaic.version = 11 : i64} {
  func.func @_matmul_ssq_kernel(%arg0: i32, %arg1: memref<64x384xbf16, #tpu.memory_space<vmem>>, %arg2: memref<384x128xbf16, #tpu.memory_space<vmem>>, %arg3: memref<64x128xbf16, #tpu.memory_space<vmem>>, %arg4: memref<8x128xf32, #tpu.memory_space<vmem>>) attributes {dimension_semantics = [#tpu.dimension_semantics<parallel>], iteration_bounds = array<i64: 1>, scalar_prefetch = 0 : i64, scratch_operands = 0 : i64, tpu.core_type = #tpu.core_type<tc>, window_params = [{transform_indices = @transform_0, window_bounds = array<i64: 64, 384>}, {pipeline_mode = #tpu.pipeline_mode<synchronous>, transform_indices = @transform_1, window_bounds = array<i64: 384, 128>}, {transform_indices = @transform_2, window_bounds = array<i64: 64, 128>}, {transform_indices = @transform_3, window_bounds = array<i64: 8, 128>}]} {
    %c0 = arith.constant 0 : index
    %c0_0 = arith.constant 0 : index
    %0 = vector.load %arg1[%c0, %c0_0] : memref<64x384xbf16, #tpu.memory_space<vmem>>, vector<64x384xbf16>
    %c0_1 = arith.constant 0 : index
    %c0_2 = arith.constant 0 : index
    %1 = vector.load %arg2[%c0_1, %c0_2] : memref<384x128xbf16, #tpu.memory_space<vmem>>, vector<384x128xbf16>
    %cst = arith.constant dense<0.000000e+00> : vector<64x128xf32>
    %2 = tpu.matmul %0, %1, %cst {dimension_numbers = #tpu.dot_dimension_numbers<[1], [0], [0], [1], [0, 0, 1, 1], [], []>} : vector<64x384xbf16>, vector<384x128xbf16>, vector<64x128xf32> -> vector<64x128xf32>
    %3 = arith.truncf %2 : vector<64x128xf32> to vector<64x128xbf16>
    %c0_3 = arith.constant 0 : index
    %c0_4 = arith.constant 0 : index
    %4 = vector.load %arg3[%c0_3, %c0_4] : memref<64x128xbf16, #tpu.memory_space<vmem>>, vector<64x128xbf16>
    tpu.vector_store %arg3[%c0_3, %c0_4], %3 {strides = array<i32>} : memref<64x128xbf16, #tpu.memory_space<vmem>>, vector<64x128xbf16>,
    %5 = arith.mulf %2, %2 : vector<64x128xf32>
    %cst_5 = arith.constant dense<0.000000e+00> : vector<128xf32>
    %6 = vector.multi_reduction <add>, %5, %cst_5 [0] : vector<64x128xf32> to vector<128xf32>
    %7 = vector.shape_cast %6 : vector<128xf32> to vector<1x128xf32>
    %c0_6 = arith.constant 0 : index
    %c0_7 = arith.constant 0 : index
    %8 = vector.load %arg4[%c0_6, %c0_7] : memref<8x128xf32, #tpu.memory_space<vmem>>, vector<1x128xf32>
    tpu.vector_store %arg4[%c0_6, %c0_7], %7 {strides = array<i32>} : memref<8x128xf32, #tpu.memory_space<vmem>>, vector<1x128xf32>,
    return
  }
  func.func @transform_0(%arg0: i32) -> (i32, i32) {
    %c0_i32 = arith.constant 0 : i32
    %c0_i32_0 = arith.constant 0 : i32
    return %arg0, %c0_i32 : i32, i32
  }
  func.func @transform_1(%arg0: i32) -> (i32, i32) {
    %c0_i32 = arith.constant 0 : i32
    %c0_i32_0 = arith.constant 0 : i32
    %c0_i32_1 = arith.constant 0 : i32
    return %c0_i32, %c0_i32_0 : i32, i32
  }
  func.func @transform_2(%arg0: i32) -> (i32, i32) {
    %c0_i32 = arith.constant 0 : i32
    %c0_i32_0 = arith.constant 0 : i32
    return %arg0, %c0_i32 : i32, i32
  }
  func.func @transform_3(%arg0: i32) -> (i32, i32) {
    %c0_i32 = arith.constant 0 : i32
    %c0_i32_0 = arith.constant 0 : i32
    return %arg0, %c0_i32 : i32, i32
  }
}

module attributes {stable_mosaic.version = 11 : i64} {
  func.func @_matmul_ssq_kernel(%arg0: i32, %arg1: memref<128x384xbf16, #tpu.memory_space<vmem>>, %arg2: memref<384x128xbf16, #tpu.memory_space<vmem>>, %arg3: memref<128x128xbf16, #tpu.memory_space<vmem>>, %arg4: memref<8x128xf32, #tpu.memory_space<vmem>>) attributes {dimension_semantics = [#tpu.dimension_semantics<parallel>], iteration_bounds = array<i64: 1>, scalar_prefetch = 0 : i64, scratch_operands = 0 : i64, tpu.core_type = #tpu.core_type<tc>, window_params = [{transform_indices = @transform_0, window_bounds = array<i64: 128, 384>}, {pipeline_mode = #tpu.pipeline_mode<synchronous>, transform_indices = @transform_1, window_bounds = array<i64: 384, 128>}, {transform_indices = @transform_2, window_bounds = array<i64: 128, 128>}, {transform_indices = @transform_3, window_bounds = array<i64: 8, 128>}]} {
    %c0 = arith.constant 0 : index
    %c0_0 = arith.constant 0 : index
    %0 = vector.load %arg1[%c0, %c0_0] : memref<128x384xbf16, #tpu.memory_space<vmem>>, vector<128x384xbf16>
    %c0_1 = arith.constant 0 : index
    %c0_2 = arith.constant 0 : index
    %1 = vector.load %arg2[%c0_1, %c0_2] : memref<384x128xbf16, #tpu.memory_space<vmem>>, vector<384x128xbf16>
    %cst = arith.constant dense<0.000000e+00> : vector<128x128xf32>
    %2 = tpu.matmul %0, %1, %cst {dimension_numbers = #tpu.dot_dimension_numbers<[1], [0], [0], [1], [0, 0, 1, 1], [], []>} : vector<128x384xbf16>, vector<384x128xbf16>, vector<128x128xf32> -> vector<128x128xf32>
    %3 = arith.truncf %2 : vector<128x128xf32> to vector<128x128xbf16>
    %c0_3 = arith.constant 0 : index
    %c0_4 = arith.constant 0 : index
    %4 = vector.load %arg3[%c0_3, %c0_4] : memref<128x128xbf16, #tpu.memory_space<vmem>>, vector<128x128xbf16>
    tpu.vector_store %arg3[%c0_3, %c0_4], %3 {strides = array<i32>} : memref<128x128xbf16, #tpu.memory_space<vmem>>, vector<128x128xbf16>,
    %5 = arith.mulf %2, %2 : vector<128x128xf32>
    %cst_5 = arith.constant dense<0.000000e+00> : vector<128xf32>
    %6 = vector.multi_reduction <add>, %5, %cst_5 [0] : vector<128x128xf32> to vector<128xf32>
    %7 = vector.shape_cast %6 : vector<128xf32> to vector<1x128xf32>
    %c0_6 = arith.constant 0 : index
    %c0_7 = arith.constant 0 : index
    %8 = vector.load %arg4[%c0_6, %c0_7] : memref<8x128xf32, #tpu.memory_space<vmem>>, vector<1x128xf32>
    tpu.vector_store %arg4[%c0_6, %c0_7], %7 {strides = array<i32>} : memref<8x128xf32, #tpu.memory_space<vmem>>, vector<1x128xf32>,
    return
  }
  func.func @transform_0(%arg0: i32) -> (i32, i32) {
    %c0_i32 = arith.constant 0 : i32
    %c0_i32_0 = arith.constant 0 : i32
    return %arg0, %c0_i32 : i32, i32
  }
  func.func @transform_1(%arg0: i32) -> (i32, i32) {
    %c0_i32 = arith.constant 0 : i32
    %c0_i32_0 = arith.constant 0 : i32
    %c0_i32_1 = arith.constant 0 : i32
    return %c0_i32, %c0_i32_0 : i32, i32
  }
  func.func @transform_2(%arg0: i32) -> (i32, i32) {
    %c0_i32 = arith.constant 0 : i32
    %c0_i32_0 = arith.constant 0 : i32
    return %arg0, %c0_i32 : i32, i32
  }
  func.func @transform_3(%arg0: i32) -> (i32, i32) {
    %c0_i32 = arith.constant 0 : i32
    %c0_i32_0 = arith.constant 0 : i32
    return %arg0, %c0_i32 : i32, i32
  }
}

module attributes {stable_mosaic.version = 11 : i64} {
  func.func @_matmul_tanh_kernel(%arg0: i32, %arg1: memref<256x256xbf16, #tpu.memory_space<vmem>>, %arg2: memref<256x128xbf16, #tpu.memory_space<vmem>>, %arg3: memref<256x128xf32, #tpu.memory_space<vmem>>) attributes {dimension_semantics = [#tpu.dimension_semantics<parallel>], iteration_bounds = array<i64: 1>, scalar_prefetch = 0 : i64, scratch_operands = 0 : i64, tpu.core_type = #tpu.core_type<tc>, window_params = [{transform_indices = @transform_0, window_bounds = array<i64: 256, 256>}, {pipeline_mode = #tpu.pipeline_mode<synchronous>, transform_indices = @transform_1, window_bounds = array<i64: 256, 128>}, {transform_indices = @transform_2, window_bounds = array<i64: 256, 128>}]} {
    %c0 = arith.constant 0 : index
    %c0_0 = arith.constant 0 : index
    %0 = vector.load %arg1[%c0, %c0_0] : memref<256x256xbf16, #tpu.memory_space<vmem>>, vector<256x256xbf16>
    %c0_1 = arith.constant 0 : index
    %c0_2 = arith.constant 0 : index
    %1 = vector.load %arg2[%c0_1, %c0_2] : memref<256x128xbf16, #tpu.memory_space<vmem>>, vector<256x128xbf16>
    %cst = arith.constant dense<0.000000e+00> : vector<256x128xf32>
    %2 = tpu.matmul %0, %1, %cst {dimension_numbers = #tpu.dot_dimension_numbers<[1], [0], [0], [1], [0, 0, 1, 1], [], []>} : vector<256x256xbf16>, vector<256x128xbf16>, vector<256x128xf32> -> vector<256x128xf32>
    %3 = math.tanh %2 : vector<256x128xf32>
    %c0_3 = arith.constant 0 : index
    %c0_4 = arith.constant 0 : index
    %4 = vector.load %arg3[%c0_3, %c0_4] : memref<256x128xf32, #tpu.memory_space<vmem>>, vector<256x128xf32>
    tpu.vector_store %arg3[%c0_3, %c0_4], %3 {strides = array<i32>} : memref<256x128xf32, #tpu.memory_space<vmem>>, vector<256x128xf32>,
    return
  }
  func.func @transform_0(%arg0: i32) -> (i32, i32) {
    %c0_i32 = arith.constant 0 : i32
    %c0_i32_0 = arith.constant 0 : i32
    return %arg0, %c0_i32 : i32, i32
  }
  func.func @transform_1(%arg0: i32) -> (i32, i32) {
    %c0_i32 = arith.constant 0 : i32
    %c0_i32_0 = arith.constant 0 : i32
    %c0_i32_1 = arith.constant 0 : i32
    return %c0_i32, %c0_i32_0 : i32, i32
  }
  func.func @transform_2(%arg0: i32) -> (i32, i32) {
    %c0_i32 = arith.constant 0 : i32
    %c0_i32_0 = arith.constant 0 : i32
    return %arg0, %c0_i32 : i32, i32
  }
}

</mosaic_0001>

<bundles_post_ra>
// kernel: tile.38
= control target key start
LH: loop header
LB: loop body
LE: loop exit
PB: predicated region body
PF: predicated region fallthrough
CT: control target
= control target key end

     0   :  { %s22_s0 = inlined_call_operand.vmem [shape: f32[32], index: 0, kind: input, shape index: {}]   ;;  %s23_s1 = inlined_call_operand.vmem [shape: f32[4,32], index: 1, kind: output, shape index: {}]  }
   0x1   :  { %v4_v0 = vld [vmem:[%s22_s0] ss:$0 sm:$0xff] }
   0x2   :  { %5 = vst [vmem:[%s23_s1] sm:$0xf] %v4_v0 }

// kernel: generator_forward.4
= control target key start
LH: loop header
LB: loop body
LE: loop exit
PB: predicated region body
PF: predicated region fallthrough
CT: control target
= control target key end

     0   :  { %9 = vsyncpa [#allocation3], 0  ;;  %s836_s12 = smov [#allocation2]   ;;  %s901_s0 = inlined_call_operand.vmem [shape: bf16[32,640], index: 0, kind: input, shape index: {}]   ;;  %s902_s1 = inlined_call_operand.hbm [shape: bf16[640,128], index: 1, kind: input, shape index: {}]   ;;  %s903_s2 = inlined_call_operand.vmem [shape: bf16[32,128], index: 2, kind: output, shape index: {0}]   ;;  %s904_s3 = inlined_call_operand.vmem [shape: f32[8,128], index: 3, kind: output, shape index: {1}]  }
   0x1   :  { %s17_s13 = sshll.u32 %s836_s12, 4  ;;  %s18_s13 = int_to_ptr.vmem [resolvable:$true] %s17_s13 }
   0x2   :  { %s822_s14 = scalar_lea.vmem %s18_s13, 5120  ;;  %p827_p1 = scmp.lt.s32.totalorder %s18_s13, %s18_s13 }
   0x3   :  { %p823_p0 = scmp.ne.s32.totalorder %s18_s13, %s822_s14  ;;  %p828_p2 = scmp.lt.s32.totalorder %s822_s14, %s822_s14 }
   0x5   :  { %p829_p3 = por %p828_p2, %p827_p1 }
   0x7   :  { %p830_p4 = pnand %p829_p3, %p823_p0 }
   0x9   :  { %833 = shalt.err (!%p830_p4)
}
   0xa   :  { %s837_s15 = smov 64   ;;  %s838_s16 = smov 4  }
   0xb   :  { %23 = dma.hbm_to_vmem [thread:$0]  %s902_s1, 5120, %s18_s13, [#allocation3], %s837_s15, %s837_s15, %s838_s16  }
   0xc   :  { %834 = dma.done.wait [#allocation3], 5120  }
   0xd   :  { %835 = vsyncadd [#allocation3], 4294962176  ;;  %v760_v0 = vld [vmem:[#allocation2 + $0x78] sm:$0xff]   ;;  %v764_v4 = vld [vmem:[#allocation2 + $0x70] sm:$0xff]  }
   0xe   :  { %v761_v1 = vld [vmem:[#allocation2 + $0xf8] sm:$0xff]   ;;  %671 = vmatprep.subr.bf16.mxu0 %v760_v0  ;;  %v765_v5 = vld [vmem:[#allocation2 + $0xf0] sm:$0xff]   ;;  %v768_v8 = vld [vmem:[#allocation2 + $0x68] sm:$0xff]  }
   0xf   :  { %v762_v2 = vld [vmem:[#allocation2 + $0x38] sm:$0xff]   ;;  %699 = vmatprep.subr.bf16.mxu1 %v761_v1  ;;  %v766_v6 = vld [vmem:[#allocation2 + $0x30] sm:$0xff]   ;;  %v769_v9 = vld [vmem:[#allocation2 + $0xe8] sm:$0xff]  }
  0x10   :  { %v763_v3 = vld [vmem:[#allocation2 + $0xb8] sm:$0xff]   ;;  %672 = vmatpush3.bf16.msra.mxu0 %v762_v2  ;;  %v767_v7 = vld [vmem:[#allocation2 + $0xb0] sm:$0xff]   ;;  %v770_v10 = vld [vmem:[#allocation2 + $0x28] sm:$0xff]  }
  0x11   :  { %700 = vmatpush3.bf16.msra.mxu1 %v763_v3  ;;  %673 = vmatprep.subr.bf16.mxu0 %v764_v4  ;;  %v771_v11 = vld [vmem:[#allocation2 + $0xa8] sm:$0xff]   ;;  %v772_v12 = vld [vmem:[#allocation2 + $0x60] sm:$0xff]   ;;  %v776_v16 = vld [vmem:[#allocation2 + $0x58] sm:$0xff]  }
  0x12   :  { %701 = vmatprep.subr.bf16.mxu1 %v765_v5  ;;  %v773_v13 = vld [vmem:[#allocation2 + $0xe0] sm:$0xff]   ;;  %v777_v17 = vld [vmem:[#allocation2 + $0xd8] sm:$0xff]   ;;  %v780_v20 = vld [vmem:[#allocation2 + $0x50] sm:$0xff]  }
  0x13   :  { %v774_v14 = vld [vmem:[#allocation2 + $0x20] sm:$0xff]   ;;  %v778_v18 = vld [vmem:[#allocation2 + $0x18] sm:$0xff]   ;;  %v781_v21 = vld [vmem:[#allocation2 + $0xd0] sm:$0xff]  }
  0x14   :  { %674 = vmatpush3.bf16.msra.mxu0 %v766_v6  ;;  %v775_v15 = vld [vmem:[#allocation2 + $0xa0] sm:$0xff]   ;;  %v779_v19 = vld [vmem:[#allocation2 + $0x98] sm:$0xff]   ;;  %v782_v22 = vld [vmem:[#allocation2 + $0x10] sm:$0xff]  }
  0x15   :  { %702 = vmatpush3.bf16.msra.mxu1 %v767_v7  ;;  %675 = vmatprep.subr.bf16.mxu0 %v768_v8  ;;  %v783_v23 = vld [vmem:[#allocation2 + $0x90] sm:$0xff]   ;;  %v784_v24 = vld [vmem:[#allocation2 + $0x48] sm:$0xff]   ;;  %v788_v28 = vld [vmem:[#allocation2 + $0x40] sm:$0xff]  }
  0x16   :  { %703 = vmatprep.subr.bf16.mxu1 %v769_v9  ;;  %v785_v25 = vld [vmem:[#allocation2 + $0xc8] sm:$0xff]   ;;  %v789_v29 = vld [vmem:[#allocation2 + $0xc0] sm:$0xff]   ;;  %v798_v36 = vld [vmem:[#allocation2 + $0x138] sm:$0xff]  }
  0x17   :  { %v786_v26 = vld [vmem:[#allocation2 + $0x8] sm:$0xff]   ;;  %v790_v30 = vld [vmem:[#allocation2] sm:$0xff]   ;;  %v799_v37 = vld [vmem:[#allocation2 + $0x130] sm:$0xff]  }
  0x18   :  { %676 = vmatpush3.bf16.msra.mxu0 %v770_v10  ;;  %v787_v27 = vld [vmem:[#allocation2 + $0x88] sm:$0xff]   ;;  %v791_v31 = vld [vmem:[#allocation2 + $0x80] sm:$0xff]   ;;  %v802_v45 = vld [vmem:[#allocation2 + $0x118] sm:$0xff]  }
  0x19   :  { %704 = vmatpush3.bf16.msra.mxu1 %v771_v11  ;;  %677 = vmatprep.subr.bf16.mxu0 %v772_v12  ;;  %v792_v32 = vld [vmem:[%s901_s0] ss:$20 sps:$4 sm:$0xff]   ;;  %v794_v33 = vld [vmem:[%s901_s0 + $0x4] ss:$20 sps:$4 sm:$0xff]   ;;  %v795_v34 = vld [vmem:[%s901_s0 + $0x8] ss:$20 sps:$4 sm:$0xff]  }
  0x1a   :  { %705 = vmatprep.subr.bf16.mxu1 %v773_v13  ;;  %v797_v35 = vld [vmem:[%s901_s0 + $0xc] ss:$20 sps:$4 sm:$0xff]   ;;  %444 = vmatprep.mubr.bf16.mxu0 %v794_v33  ;;  %v805_v40 = vld [vmem:[%s901_s0 + $0x34] ss:$20 sps:$4 sm:$0xff]   ;;  %v808_v42 = vld [vmem:[%s901_s0 + $0x30] ss:$20 sps:$4 sm:$0xff]  }
  0x1b   :  { %493 = vmatprep.mubr.bf16.mxu1 %v797_v35  ;;  %v800_v38 = vld [vmem:[#allocation2 + $0x128] sm:$0xff]   ;;  %v801_v43 = vld [vmem:[#allocation2 + $0x120] sm:$0xff]   ;;  %v809_v46 = vld [vmem:[#allocation2 + $0x110] sm:$0xff]  }
  0x1c   :  { %678 = vmatpush3.bf16.msra.mxu0 %v774_v14  ;;  %v803_v39 = vld [vmem:[%s901_s0 + $0x2c] ss:$20 sps:$4 sm:$0xff]   ;;  %v807_v41 = vld [vmem:[%s901_s0 + $0x28] ss:$20 sps:$4 sm:$0xff]   ;;  %v812_v44 = vld [vmem:[%s901_s0 + $0x10] ss:$20 sps:$4 sm:$0xff]  }
  0x1d   :  { %706 = vmatpush3.bf16.msra.mxu1 %v775_v15  ;;  %679 = vmatprep.subr.bf16.mxu0 %v776_v16  ;;  %v810_v47 = vld [vmem:[#allocation2 + $0x108] sm:$0xff]   ;;  %v811_v48 = vld [vmem:[#allocation2 + $0x100] sm:$0xff]  }
  0x1e   :  { %707 = vmatprep.subr.bf16.mxu1 %v777_v17  ;;  %v813_v49 = vld [vmem:[%s901_s0 + $0x38] ss:$20 sps:$4 sm:$0xff]  }
  0x20   :  { %680 = vmatpush3.bf16.msra.mxu0 %v778_v18 }
  0x21   :  { %708 = vmatpush3.bf16.msra.mxu1 %v779_v19  ;;  %681 = vmatprep.subr.bf16.mxu0 %v780_v20 }
  0x22   :  { %709 = vmatprep.subr.bf16.mxu1 %v781_v21 }
  0x24   :  { %682 = vmatpush3.bf16.msra.mxu0 %v782_v22 }
  0x25   :  { %710 = vmatpush3.bf16.msra.mxu1 %v783_v23  ;;  %683 = vmatprep.subr.bf16.mxu0 %v784_v24 }
  0x26   :  { %711 = vmatprep.subr.bf16.mxu1 %v785_v25 }
  0x28   :  { %684 = vmatpush3.bf16.msra.mxu0 %v786_v26 }
  0x29   :  { %712 = vmatpush3.bf16.msra.mxu1 %v787_v27  ;;  %685 = vmatprep.subr.bf16.mxu0 %v788_v28 }
  0x2a   :  { %713 = vmatprep.subr.bf16.mxu1 %v789_v29 }
  0x2c   :  { %686 = vmatpush3.bf16.msra.mxu0 %v790_v30 }
  0x2d   :  { %714 = vmatpush3.bf16.msra.mxu1 %v791_v31  ;;  %737 = vmatprep.subr.bf16.mxu0 %v798_v36 }
  0x2f   :  { %445 = vmatmul.mubr.bf16.vlgmr.msra.gmra.mxu0 %v792_v32 }
  0x30   :  { %494 = vmatmul.mubr.bf16.vlgmr.msra.gmra.mxu1 %v795_v34  ;;  %738 = vmatpush3.bf16.msra.mxu0 %v798_v36 }
  0x31   :  { %739 = vmatprep.subr.bf16.mxu0 %v799_v37  ;;  %452 = vmatprep.mubr.bf16.mxu0 %v803_v39 }
  0x32   :  { %501 = vmatprep.mubr.bf16.mxu1 %v805_v40 }
  0x34   :  { %740 = vmatpush3.bf16.msra.mxu0 %v799_v37 }
  0x35   :  { %741 = vmatprep.subr.bf16.mxu0 %v800_v38 }
  0x37   :  { %453 = vmatmul.mubr.bf16.gmra.mxu0 %v807_v41 }
  0x38   :  { %502 = vmatmul.mubr.bf16.gmra.mxu1 %v808_v42  ;;  %742 = vmatpush3.bf16.msra.mxu0 %v800_v38 }
  0x39   :  { %743 = vmatprep.subr.bf16.mxu0 %v801_v43  ;;  %753 = vmatprep.mubr.bf16.mxu0 %v812_v44 }
  0x3c   :  { %744 = vmatpush3.bf16.msra.mxu0 %v801_v43 }
  0x3d   :  { %745 = vmatprep.subr.bf16.mxu0 %v802_v45 }
  0x40   :  { %746 = vmatpush3.bf16.msra.mxu0 %v802_v45 }
  0x41   :  { %747 = vmatprep.subr.bf16.mxu0 %v809_v46 }
  0x44   :  { %748 = vmatpush3.bf16.msra.mxu0 %v809_v46 }
  0x45   :  { %749 = vmatprep.subr.bf16.mxu0 %v810_v47 }
  0x48   :  { %750 = vmatpush3.bf16.msra.mxu0 %v810_v47 }
  0x49   :  { %751 = vmatprep.subr.bf16.mxu0 %v811_v48 }
  0x4c   :  { %752 = vmatpush3.bf16.msra.mxu0 %v811_v48 }
  0x4f   :  { %754 = vmatmul.mubr.bf16.vlgmr.msra.gmra.mxu0 %v813_v49 }
  0xef   :  { %v687_v50 = vpop.f32.mrf.mxu0 }
  0xf0   :  { %v715_v51 = vpop.f32.mrf.mxu1 }
  0xf1   :  { %v688_v52 = vpop.f32.mrf.mxu0 }
  0xf2   :  { %v716_v53 = vpop.f32.mrf.mxu1  ;;  %v689_v2 = vadd.f32 %v688_v52, %v687_v50 }
  0xf3   :  { %v690_v54 = vpop.f32.mrf.mxu0  ;;  %v717_v3 = vadd.f32 %v716_v53, %v715_v51 }
  0xf4   :  { %v718_v55 = vpop.f32.mrf.mxu1 }
  0xf5   :  { %v691_v56 = vpop.f32.mrf.mxu0  ;;  %v496_v13 = vadd.f32 %v717_v3, %v689_v2 }
  0xf6   :  { %v719_v57 = vpop.f32.mrf.mxu1  ;;  %v692_v9 = vadd.f32 %v691_v56, %v690_v54 }
  0xf7   :  { %v693_v58 = vpop.f32.mrf.mxu0  ;;  %v720_v10 = vadd.f32 %v719_v57, %v718_v55 }
  0xf8   :  { %v721_v59 = vpop.f32.mrf.mxu1 }
  0xf9   :  { %v694_v60 = vpop.f32.mrf.mxu0  ;;  %v499_v19 = vadd.f32 %v720_v10, %v692_v9 }
  0xfa   :  { %v722_v61 = vpop.f32.mrf.mxu1  ;;  %v695_v4 = vadd.f32 %v694_v60, %v693_v58 }
  0xfb   :  { %v696_v62 = vpop.f32.mrf.mxu0  ;;  %v723_v5 = vadd.f32 %v722_v61, %v721_v59 }
  0xfc   :  { %v724_v63 = vpop.f32.mrf.mxu1 }
  0xfd   :  { %v697_v0 = vpop.f32.mrf.mxu0  ;;  %v504_v12 = vadd.f32 %v723_v5, %v695_v4 }
  0xfe   :  { %v725_v1 = vpop.f32.mrf.mxu1  ;;  %v698_v6 = vadd.f32 %v697_v0, %v696_v62 }
  0xff   :  { %v726_v7 = vadd.f32 %v725_v1, %v724_v63 }
 0x101   :  { %v507_v14 = vadd.f32 %v726_v7, %v698_v6 }
 0x10f   :  { %v755_v8 = vpop.f32.mrf.mxu0 }
 0x110   :  { %v553_v16 = vadd.f32 %v755_v8, %v504_v12 }
 0x111   :  { %v544_v11 = vpop.f32.mrf.mxu0 }
 0x112   :  { %v545_v17 = vadd.f32 %v544_v11, %v496_v13  ;;  %v581_v26 = vmul.f32 %v553_v16, %v553_v16 }
 0x113   :  { %v756_v15 = vpop.f32.mrf.mxu0 }
 0x114   :  { %v556_v18 = vadd.f32 %v756_v15, %v507_v14  ;;  %v579_v23 = vmul.f32 %v545_v17, %v545_v17 }
 0x115   :  { %v547_v20 = vpop.f32.mrf.mxu0 }
 0x116   :  { %v668_v21 = vpack.c.bf16 %v556_v18, %v553_v16  ;;  %v548_v22 = vadd.f32 %v547_v20, %v499_v19  ;;  %v582_v28 = vmul.f32 %v556_v18, %v556_v18 }
 0x118   :  { %670 = vst [vmem:[%s903_s2 + $0x8] sm:$0xff] %v668_v21   ;;  %v663_v24 = vpack.c.bf16 %v548_v22, %v545_v17  ;;  %v580_v25 = vmul.f32 %v548_v22, %v548_v22 }
 0x11a   :  { %664 = vst [vmem:[%s903_s2] sm:$0xff] %v663_v24   ;;  %v583_v27 = vadd.f32 %v580_v25, %v579_v23 }
 0x11c   :  { %v584_v29 = vadd.f32 %v583_v27, %v581_v26 }
 0x11e   :  { %v585_v30 = vadd.f32 %v584_v29, %v582_v28 }
 0x120   :  { %v586_v31 = vrot.slane %v585_v30, 4 }
 0x122   :  { %v587_v32 = vadd.f32 %v586_v31, %v585_v30 }
 0x124   :  { %v588_v33 = vrot.slane %v587_v32, 2 }
 0x126   :  { %v589_v34 = vadd.f32 %v588_v33, %v587_v32 }
 0x128   :  { %v590_v35 = vrot.slane %v589_v34, 1 }
 0x12a   :  { %v591_v36 = vadd.f32 %v590_v35, %v589_v34 }
 0x12c   :  { %592 = vst [vmem:[%s904_s3] sm:$0x1] %v591_v36 }
 0x12d   :  { %601 = vsyncpa [#allocation3], 1 }

// kernel: tile.48
= control target key start
LH: loop header
LB: loop body
LE: loop exit
PB: predicated region body
PF: predicated region fallthrough
CT: control target
= control target key end

     0   :  { %s22_s0 = inlined_call_operand.vmem [shape: f32[16], index: 0, kind: input, shape index: {}]   ;;  %s23_s1 = inlined_call_operand.vmem [shape: f32[8,16], index: 1, kind: output, shape index: {}]  }
   0x1   :  { %v4_v0 = vld [vmem:[%s22_s0] ss:$0 sm:$0xff] }
   0x2   :  { %5 = vst [vmem:[%s23_s1] sm:$0xff] %v4_v0 }

// kernel: generator_forward.5
= control target key start
LH: loop header
LB: loop body
LE: loop exit
PB: predicated region body
PF: predicated region fallthrough
CT: control target
= control target key end

     0   :  { %s820_s1 = inlined_call_operand.vmem [shape: bf16[384,128], index: 1, kind: input, shape index: {}]   ;;  %s821_s0 = inlined_call_operand.vmem [shape: bf16[64,384], index: 0, kind: input, shape index: {}]   ;;  %s822_s2 = inlined_call_operand.vmem [shape: bf16[64,128], index: 2, kind: output, shape index: {0}]   ;;  %s823_s3 = inlined_call_operand.vmem [shape: f32[8,128], index: 3, kind: output, shape index: {1}]  }
   0x1   :  { %v637_v0 = vld [vmem:[%s820_s1 + $0x78] sm:$0xff]   ;;  %v640_v3 = vld [vmem:[%s820_s1 + $0x70] sm:$0xff]   ;;  %v643_v6 = vld [vmem:[%s820_s1 + $0x68] sm:$0xff]  }
   0x2   :  { %v638_v1 = vld [vmem:[%s820_s1 + $0x38] sm:$0xff]   ;;  %561 = vmatprep.subr.bf16.mxu0 %v637_v0  ;;  %v641_v4 = vld [vmem:[%s820_s1 + $0x30] sm:$0xff]   ;;  %v644_v7 = vld [vmem:[%s820_s1 + $0x28] sm:$0xff]  }
   0x3   :  { %v639_v2 = vld [vmem:[%s820_s1 + $0xb8] sm:$0xff]   ;;  %562 = vmatpush3.bf16.msra.mxu0 %v638_v1  ;;  %v642_v5 = vld [vmem:[%s820_s1 + $0xb0] sm:$0xff]   ;;  %v645_v8 = vld [vmem:[%s820_s1 + $0xa8] sm:$0xff]  }
   0x4   :  { %613 = vmatprep.subr.bf16.mxu1 %v639_v2  ;;  %563 = vmatprep.subr.bf16.mxu0 %v640_v3  ;;  %v646_v9 = vld [vmem:[%s820_s1 + $0x60] sm:$0xff]   ;;  %v649_v12 = vld [vmem:[%s820_s1 + $0x58] sm:$0xff]   ;;  %v652_v15 = vld [vmem:[%s820_s1 + $0x50] sm:$0xff]  }
   0x5   :  { %614 = vmatpush3.bf16.msra.mxu1 %v639_v2  ;;  %v647_v10 = vld [vmem:[%s820_s1 + $0x20] sm:$0xff]   ;;  %v651_v13 = vld [vmem:[%s820_s1 + $0x98] sm:$0xff]   ;;  %v654_v16 = vld [vmem:[%s820_s1 + $0x90] sm:$0xff]  }
   0x6   :  { %615 = vmatprep.subr.bf16.mxu1 %v642_v5  ;;  %v648_v11 = vld [vmem:[%s820_s1 + $0xa0] sm:$0xff]   ;;  %v650_v14 = vld [vmem:[%s820_s1 + $0x18] sm:$0xff]   ;;  %v653_v17 = vld [vmem:[%s820_s1 + $0x10] sm:$0xff]  }
   0x7   :  { %564 = vmatpush3.bf16.msra.mxu0 %v641_v4  ;;  %v655_v18 = vld [vmem:[%s820_s1 + $0x48] sm:$0xff]   ;;  %v658_v21 = vld [vmem:[%s820_s1 + $0x40] sm:$0xff]   ;;  %v673_v32 = vld [vmem:[%s821_s0 + $0x50] ss:$12 sps:$4 sm:$0xff]  }
   0x8   :  { %565 = vmatprep.subr.bf16.mxu0 %v643_v6  ;;  %v656_v19 = vld [vmem:[%s820_s1 + $0x8] sm:$0xff]   ;;  %v660_v22 = vld [vmem:[%s820_s1 + $0x80] sm:$0xff]   ;;  %v672_v33 = vld [vmem:[%s821_s0 + $0x30] ss:$12 sps:$4 sm:$0xff]  }
   0x9   :  { %616 = vmatpush3.bf16.msra.mxu1 %v642_v5  ;;  %v657_v20 = vld [vmem:[%s820_s1 + $0x88] sm:$0xff]   ;;  %v663_v23 = vld [vmem:[%s821_s0 + $0x4] ss:$12 sps:$4 sm:$0xff]   ;;  %v669_v31 = vld [vmem:[%s821_s0 + $0x34] ss:$12 sps:$4 sm:$0xff]  }
   0xa   :  { %617 = vmatprep.subr.bf16.mxu1 %v645_v8  ;;  %v664_v24 = vld [vmem:[%s821_s0 + $0x8] ss:$12 sps:$4 sm:$0xff]   ;;  %v659_v25 = vld [vmem:[%s820_s1] sm:$0xff]   ;;  %318 = vmatprep.mubr.bf16.mxu0 %v663_v23  ;;  %v674_v34 = vld [vmem:[%s821_s0 + $0x4c] ss:$12 sps:$4 sm:$0xff]  }
   0xb   :  { %566 = vmatpush3.bf16.msra.mxu0 %v644_v7  ;;  %629 = vmatprep.mubr.bf16.mxu1 %v664_v24  ;;  %v661_v26 = vld [vmem:[%s821_s0] ss:$12 sps:$4 sm:$0xff]   ;;  %v666_v27 = vld [vmem:[%s821_s0 + $0x1c] ss:$12 sps:$4 sm:$0xff]   ;;  %v671_v29 = vld [vmem:[%s821_s0 + $0x38] ss:$12 sps:$4 sm:$0xff]  }
   0xc   :  { %567 = vmatprep.subr.bf16.mxu0 %v646_v9  ;;  %v665_v28 = vld [vmem:[%s821_s0 + $0x20] ss:$12 sps:$4 sm:$0xff]   ;;  %v668_v30 = vld [vmem:[%s821_s0 + $0x18] ss:$12 sps:$4 sm:$0xff]   ;;  %v676_v35 = vld [vmem:[%s821_s0 + $0x48] ss:$12 sps:$4 sm:$0xff]  }
   0xd   :  { %618 = vmatpush3.bf16.msra.mxu1 %v645_v8 }
   0xe   :  { %619 = vmatprep.subr.bf16.mxu1 %v648_v11 }
   0xf   :  { %568 = vmatpush3.bf16.msra.mxu0 %v647_v10 }
  0x10   :  { %569 = vmatprep.subr.bf16.mxu0 %v649_v12 }
  0x11   :  { %620 = vmatpush3.bf16.msra.mxu1 %v648_v11 }
  0x12   :  { %621 = vmatprep.subr.bf16.mxu1 %v651_v13 }
  0x13   :  { %570 = vmatpush3.bf16.msra.mxu0 %v650_v14 }
  0x14   :  { %571 = vmatprep.subr.bf16.mxu0 %v652_v15 }
  0x15   :  { %622 = vmatpush3.bf16.msra.mxu1 %v651_v13 }
  0x16   :  { %623 = vmatprep.subr.bf16.mxu1 %v654_v16 }
  0x17   :  { %572 = vmatpush3.bf16.msra.mxu0 %v653_v17 }
  0x18   :  { %573 = vmatprep.subr.bf16.mxu0 %v655_v18 }
  0x19   :  { %624 = vmatpush3.bf16.msra.mxu1 %v654_v16 }
  0x1a   :  { %625 = vmatprep.subr.bf16.mxu1 %v657_v20 }
  0x1b   :  { %574 = vmatpush3.bf16.msra.mxu0 %v656_v19 }
  0x1c   :  { %575 = vmatprep.subr.bf16.mxu0 %v658_v21 }
  0x1d   :  { %626 = vmatpush3.bf16.msra.mxu1 %v657_v20 }
  0x1e   :  { %627 = vmatprep.subr.bf16.mxu1 %v660_v22 }
  0x1f   :  { %576 = vmatpush3.bf16.msra.mxu0 %v659_v25 }
  0x21   :  { %628 = vmatpush3.bf16.msra.mxu1 %v660_v22 }
  0x22   :  { %319 = vmatmul.mubr.bf16.vlgmr.msra.gmra.mxu0 %v661_v26 }
  0x23   :  { %326 = vmatprep.mubr.bf16.mxu0 %v666_v27 }
  0x24   :  { %630 = vmatmul.mubr.bf16.vlgmr.msra.gmra.mxu1 %v665_v28 }
  0x25   :  { %633 = vmatprep.mubr.bf16.mxu1 %v671_v29 }
  0x2a   :  { %327 = vmatmul.mubr.bf16.gmra.mxu0 %v668_v30 }
  0x2b   :  { %334 = vmatprep.mubr.bf16.mxu0 %v669_v31 }
  0x2c   :  { %634 = vmatmul.mubr.bf16.gmra.mxu1 %v673_v32 }
  0x32   :  { %335 = vmatmul.mubr.bf16.gmra.mxu0 %v672_v33 }
  0x33   :  { %342 = vmatprep.mubr.bf16.mxu0 %v674_v34 }
  0x3a   :  { %343 = vmatmul.mubr.bf16.gmra.mxu0 %v676_v35 }
  0xe2   :  { %v577_v36 = vpop.f32.mrf.mxu0 }
  0xe4   :  { %v578_v37 = vpop.f32.mrf.mxu0  ;;  %v631_v38 = vpop.f32.mrf.mxu1 }
  0xe5   :  { %v579_v41 = vadd.f32 %v578_v37, %v577_v36 }
  0xe6   :  { %v580_v39 = vpop.f32.mrf.mxu0  ;;  %v385_v40 = vpop.f32.mrf.mxu1 }
  0xe7   :  { %v386_v47 = vadd.f32 %v579_v41, %v385_v40 }
  0xe8   :  { %v581_v42 = vpop.f32.mrf.mxu0  ;;  %v632_v43 = vpop.f32.mrf.mxu1 }
  0xe9   :  { %v582_v44 = vadd.f32 %v581_v42, %v580_v39  ;;  %v456_v3 = vmul.f32 %v386_v47, %v386_v47 }
  0xea   :  { %v583_v45 = vpop.f32.mrf.mxu0  ;;  %v388_v46 = vpop.f32.mrf.mxu1 }
  0xeb   :  { %v389_v48 = vadd.f32 %v582_v44, %v388_v46 }
  0xec   :  { %v584_v49 = vpop.f32.mrf.mxu0  ;;  %v635_v52 = vpop.f32.mrf.mxu1 }
  0xed   :  { %v541_v50 = vpack.c.bf16 %v389_v48, %v386_v47  ;;  %v585_v53 = vadd.f32 %v584_v49, %v583_v45  ;;  %v457_v1 = vmul.f32 %v389_v48, %v389_v48 }
  0xee   :  { %v586_v51 = vpop.f32.mrf.mxu0  ;;  %v401_v57 = vpop.f32.mrf.mxu1 }
  0xef   :  { %542 = vst [vmem:[%s822_s2] sm:$0xff] %v541_v50   ;;  %v394_v58 = vadd.f32 %v631_v38, %v585_v53  ;;  %v464_v9 = vadd.f32 %v457_v1, %v456_v3 }
  0xf0   :  { %v587_v54 = vpop.f32.mrf.mxu0  ;;  %v636_v0 = vpop.f32.mrf.mxu1 }
  0xf1   :  { %v588_v55 = vadd.f32 %v587_v54, %v586_v51  ;;  %v458_v4 = vmul.f32 %v394_v58, %v394_v58 }
  0xf2   :  { %v589_v56 = vpop.f32.mrf.mxu0  ;;  %v404_v7 = vpop.f32.mrf.mxu1 }
  0xf3   :  { %v397_v59 = vadd.f32 %v632_v43, %v588_v55  ;;  %v465_v13 = vadd.f32 %v464_v9, %v458_v4 }
  0xf4   :  { %v590_v60 = vpop.f32.mrf.mxu0 }
  0xf5   :  { %v546_v61 = vpack.c.bf16 %v397_v59, %v394_v58  ;;  %v591_v62 = vadd.f32 %v590_v60, %v589_v56  ;;  %v459_v10 = vmul.f32 %v397_v59, %v397_v59 }
  0xf6   :  { %v592_v63 = vpop.f32.mrf.mxu0 }
  0xf7   :  { %558 = vst [vmem:[%s822_s2 + $0x8] sm:$0xff] %v546_v61   ;;  %v402_v5 = vadd.f32 %v591_v62, %v401_v57  ;;  %v466_v18 = vadd.f32 %v465_v13, %v459_v10 }
  0xf8   :  { %v593_v2 = vpop.f32.mrf.mxu0 }
  0xf9   :  { %v594_v6 = vadd.f32 %v593_v2, %v592_v63  ;;  %v460_v14 = vmul.f32 %v402_v5, %v402_v5 }
  0xfa   :  { %v595_v8 = vpop.f32.mrf.mxu0 }
  0xfb   :  { %v405_v11 = vadd.f32 %v594_v6, %v404_v7  ;;  %v467_v22 = vadd.f32 %v466_v18, %v460_v14 }
  0xfc   :  { %v596_v12 = vpop.f32.mrf.mxu0 }
  0xfd   :  { %v551_v15 = vpack.c.bf16 %v405_v11, %v402_v5  ;;  %v597_v16 = vadd.f32 %v596_v12, %v595_v8  ;;  %v461_v19 = vmul.f32 %v405_v11, %v405_v11 }
  0xfe   :  { %v598_v17 = vpop.f32.mrf.mxu0 }
  0xff   :  { %559 = vst [vmem:[%s822_s2 + $0x10] sm:$0xff] %v551_v15   ;;  %v410_v20 = vadd.f32 %v635_v52, %v597_v16  ;;  %v468_v25 = vadd.f32 %v467_v22, %v461_v19 }
 0x100   :  { %v599_v21 = vpop.f32.mrf.mxu0 }
 0x101   :  { %v462_v23 = vmul.f32 %v410_v20, %v410_v20  ;;  %v600_v24 = vadd.f32 %v599_v21, %v598_v17 }
 0x103   :  { %v413_v26 = vadd.f32 %v636_v0, %v600_v24  ;;  %v469_v27 = vadd.f32 %v468_v25, %v462_v23 }
 0x105   :  { %v556_v28 = vpack.c.bf16 %v413_v26, %v410_v20  ;;  %v463_v29 = vmul.f32 %v413_v26, %v413_v26 }
 0x107   :  { %560 = vst [vmem:[%s822_s2 + $0x18] sm:$0xff] %v556_v28   ;;  %v470_v30 = vadd.f32 %v469_v27, %v463_v29 }
 0x109   :  { %v471_v31 = vrot.slane %v470_v30, 4 }
 0x10b   :  { %v472_v32 = vadd.f32 %v471_v31, %v470_v30 }
 0x10d   :  { %v473_v33 = vrot.slane %v472_v32, 2 }
 0x10f   :  { %v474_v34 = vadd.f32 %v473_v33, %v472_v32 }
 0x111   :  { %v475_v35 = vrot.slane %v474_v34, 1 }
 0x113   :  { %v476_v36 = vadd.f32 %v475_v35, %v474_v34 }
 0x115   :  { %477 = vst [vmem:[%s823_s3] sm:$0x1] %v476_v36 }

// kernel: tile.58
= control target key start
LH: loop header
LB: loop body
LE: loop exit
PB: predicated region body
PF: predicated region fallthrough
CT: control target
= control target key end

     0   :  { %s28_s0 = inlined_call_operand.vmem [shape: f32[8], index: 0, kind: input, shape index: {}]   ;;  %s29_s1 = inlined_call_operand.vmem [shape: f32[16,8], index: 1, kind: output, shape index: {}]  }
   0x1   :  { %v4_v0 = vld [vmem:[%s28_s0] ss:$0 sm:$0xff] }
   0x2   :  { %5 = vst [vmem:[%s29_s1] sm:$0xff] %v4_v0  ;;  %8 = vst [vmem:[%s29_s1 + $0x8] sm:$0xff] %v4_v0 }

// kernel: generator_forward.6
= control target key start
LH: loop header
LB: loop body
LE: loop exit
PB: predicated region body
PF: predicated region fallthrough
CT: control target
= control target key end

     0   :  { %s1172_s1 = inlined_call_operand.vmem [shape: bf16[384,128], index: 1, kind: input, shape index: {}]   ;;  %s1173_s0 = inlined_call_operand.vmem [shape: bf16[128,384], index: 0, kind: input, shape index: {}]   ;;  %s1174_s2 = inlined_call_operand.vmem [shape: bf16[128,128], index: 2, kind: output, shape index: {0}]   ;;  %s1175_s3 = inlined_call_operand.vmem [shape: f32[8,128], index: 3, kind: output, shape index: {1}]  }
   0x1   :  { %v925_v0 = vld [vmem:[%s1172_s1 + $0x78] sm:$0xff]   ;;  %v928_v3 = vld [vmem:[%s1172_s1 + $0x70] sm:$0xff]   ;;  %v931_v6 = vld [vmem:[%s1172_s1 + $0x68] sm:$0xff]  }
   0x2   :  { %v926_v1 = vld [vmem:[%s1172_s1 + $0x38] sm:$0xff]   ;;  %813 = vmatprep.subr.bf16.mxu0 %v925_v0  ;;  %v929_v4 = vld [vmem:[%s1172_s1 + $0x30] sm:$0xff]   ;;  %v932_v7 = vld [vmem:[%s1172_s1 + $0x28] sm:$0xff]  }
   0x3   :  { %v927_v2 = vld [vmem:[%s1172_s1 + $0xb8] sm:$0xff]   ;;  %814 = vmatpush3.bf16.msra.mxu0 %v926_v1  ;;  %v930_v5 = vld [vmem:[%s1172_s1 + $0xb0] sm:$0xff]   ;;  %v933_v8 = vld [vmem:[%s1172_s1 + $0xa8] sm:$0xff]  }
   0x4   :  { %893 = vmatprep.subr.bf16.mxu1 %v927_v2  ;;  %815 = vmatprep.subr.bf16.mxu0 %v928_v3  ;;  %v934_v9 = vld [vmem:[%s1172_s1 + $0x60] sm:$0xff]   ;;  %v937_v12 = vld [vmem:[%s1172_s1 + $0x58] sm:$0xff]   ;;  %v940_v15 = vld [vmem:[%s1172_s1 + $0x50] sm:$0xff]  }
   0x5   :  { %894 = vmatpush3.bf16.msra.mxu1 %v927_v2  ;;  %v935_v10 = vld [vmem:[%s1172_s1 + $0x20] sm:$0xff]   ;;  %v939_v13 = vld [vmem:[%s1172_s1 + $0x98] sm:$0xff]   ;;  %v942_v16 = vld [vmem:[%s1172_s1 + $0x90] sm:$0xff]  }
   0x6   :  { %895 = vmatprep.subr.bf16.mxu1 %v930_v5  ;;  %v936_v11 = vld [vmem:[%s1172_s1 + $0xa0] sm:$0xff]   ;;  %v938_v14 = vld [vmem:[%s1172_s1 + $0x18] sm:$0xff]   ;;  %v941_v17 = vld [vmem:[%s1172_s1 + $0x10] sm:$0xff]  }
   0x7   :  { %816 = vmatpush3.bf16.msra.mxu0 %v929_v4  ;;  %v943_v18 = vld [vmem:[%s1172_s1 + $0x48] sm:$0xff]   ;;  %v946_v21 = vld [vmem:[%s1172_s1 + $0x40] sm:$0xff]   ;;  %v961_v32 = vld [vmem:[%s1173_s0 + $0x50] ss:$12 sps:$4 sm:$0xff]  }
   0x8   :  { %817 = vmatprep.subr.bf16.mxu0 %v931_v6  ;;  %v944_v19 = vld [vmem:[%s1172_s1 + $0x8] sm:$0xff]   ;;  %v948_v22 = vld [vmem:[%s1172_s1 + $0x80] sm:$0xff]   ;;  %v959_v34 = vld [vmem:[%s1173_s0 + $0x30] ss:$12 sps:$4 sm:$0xff]  }
   0x9   :  { %896 = vmatpush3.bf16.msra.mxu1 %v930_v5  ;;  %v945_v20 = vld [vmem:[%s1172_s1 + $0x88] sm:$0xff]   ;;  %v951_v23 = vld [vmem:[%s1173_s0 + $0x4] ss:$12 sps:$4 sm:$0xff]   ;;  %v957_v31 = vld [vmem:[%s1173_s0 + $0x34] ss:$12 sps:$4 sm:$0xff]  }
   0xa   :  { %897 = vmatprep.subr.bf16.mxu1 %v933_v8  ;;  %v952_v24 = vld [vmem:[%s1173_s0 + $0x8] ss:$12 sps:$4 sm:$0xff]   ;;  %v947_v25 = vld [vmem:[%s1172_s1] sm:$0xff]   ;;  %398 = vmatprep.mubr.bf16.mxu0 %v951_v23  ;;  %v962_v35 = vld [vmem:[%s1173_s0 + $0x4c] ss:$12 sps:$4 sm:$0xff]  }
   0xb   :  { %818 = vmatpush3.bf16.msra.mxu0 %v932_v7  ;;  %909 = vmatprep.mubr.bf16.mxu1 %v952_v24  ;;  %v949_v26 = vld [vmem:[%s1173_s0] ss:$12 sps:$4 sm:$0xff]   ;;  %v954_v27 = vld [vmem:[%s1173_s0 + $0x1c] ss:$12 sps:$4 sm:$0xff]   ;;  %v960_v29 = vld [vmem:[%s1173_s0 + $0x38] ss:$12 sps:$4 sm:$0xff]  }
   0xc   :  { %819 = vmatprep.subr.bf16.mxu0 %v934_v9  ;;  %v953_v28 = vld [vmem:[%s1173_s0 + $0x20] ss:$12 sps:$4 sm:$0xff]   ;;  %v956_v30 = vld [vmem:[%s1173_s0 + $0x18] ss:$12 sps:$4 sm:$0xff]   ;;  %v968_v33 = vld [vmem:[%s1173_s0 + $0x68] ss:$12 sps:$4 sm:$0xff]  }
   0xd   :  { %898 = vmatpush3.bf16.msra.mxu1 %v933_v8  ;;  %v969_v36 = vld [vmem:[%s1173_s0 + $0x80] ss:$12 sps:$4 sm:$0xff]   ;;  %v975_v37 = vld [vmem:[%s1173_s0 + $0x98] ss:$12 sps:$4 sm:$0xff]   ;;  %v964_v38 = vld [vmem:[%s1173_s0 + $0x48] ss:$12 sps:$4 sm:$0xff]  }
   0xe   :  { %899 = vmatprep.subr.bf16.mxu1 %v936_v11  ;;  %v965_v39 = vld [vmem:[%s1173_s0 + $0x64] ss:$12 sps:$4 sm:$0xff]   ;;  %v967_v41 = vld [vmem:[%s1173_s0 + $0x60] ss:$12 sps:$4 sm:$0xff]   ;;  %v970_v42 = vld [vmem:[%s1173_s0 + $0x7c] ss:$12 sps:$4 sm:$0xff]  }
   0xf   :  { %820 = vmatpush3.bf16.msra.mxu0 %v935_v10  ;;  %v977_v40 = vld [vmem:[%s1173_s0 + $0xb0] ss:$12 sps:$4 sm:$0xff]   ;;  %v972_v43 = vld [vmem:[%s1173_s0 + $0x78] ss:$12 sps:$4 sm:$0xff]   ;;  %v973_v44 = vld [vmem:[%s1173_s0 + $0x94] ss:$12 sps:$4 sm:$0xff]  }
  0x10   :  { %821 = vmatprep.subr.bf16.mxu0 %v937_v12  ;;  %v976_v45 = vld [vmem:[%s1173_s0 + $0x90] ss:$12 sps:$4 sm:$0xff]   ;;  %v978_v46 = vld [vmem:[%s1173_s0 + $0xac] ss:$12 sps:$4 sm:$0xff]   ;;  %v980_v47 = vld [vmem:[%s1173_s0 + $0xa8] ss:$12 sps:$4 sm:$0xff]  }
  0x11   :  { %900 = vmatpush3.bf16.msra.mxu1 %v936_v11 }
  0x12   :  { %901 = vmatprep.subr.bf16.mxu1 %v939_v13 }
  0x13   :  { %822 = vmatpush3.bf16.msra.mxu0 %v938_v14 }
  0x14   :  { %823 = vmatprep.subr.bf16.mxu0 %v940_v15 }
  0x15   :  { %902 = vmatpush3.bf16.msra.mxu1 %v939_v13 }
  0x16   :  { %903 = vmatprep.subr.bf16.mxu1 %v942_v16 }
  0x17   :  { %824 = vmatpush3.bf16.msra.mxu0 %v941_v17 }
  0x18   :  { %825 = vmatprep.subr.bf16.mxu0 %v943_v18 }
  0x19   :  { %904 = vmatpush3.bf16.msra.mxu1 %v942_v16 }
  0x1a   :  { %905 = vmatprep.subr.bf16.mxu1 %v945_v20 }
  0x1b   :  { %826 = vmatpush3.bf16.msra.mxu0 %v944_v19 }
  0x1c   :  { %827 = vmatprep.subr.bf16.mxu0 %v946_v21 }
  0x1d   :  { %906 = vmatpush3.bf16.msra.mxu1 %v945_v20 }
  0x1e   :  { %907 = vmatprep.subr.bf16.mxu1 %v948_v22 }
  0x1f   :  { %828 = vmatpush3.bf16.msra.mxu0 %v947_v25 }
  0x21   :  { %908 = vmatpush3.bf16.msra.mxu1 %v948_v22 }
  0x22   :  { %399 = vmatmul.mubr.bf16.vlgmr.msra.gmra.mxu0 %v949_v26 }
  0x23   :  { %406 = vmatprep.mubr.bf16.mxu0 %v954_v27 }
  0x24   :  { %910 = vmatmul.mubr.bf16.vlgmr.msra.gmra.mxu1 %v953_v28 }
  0x25   :  { %913 = vmatprep.mubr.bf16.mxu1 %v960_v29 }
  0x2a   :  { %407 = vmatmul.mubr.bf16.gmra.mxu0 %v956_v30 }
  0x2b   :  { %414 = vmatprep.mubr.bf16.mxu0 %v957_v31 }
  0x2c   :  { %914 = vmatmul.mubr.bf16.gmra.mxu1 %v961_v32 }
  0x2d   :  { %917 = vmatprep.mubr.bf16.mxu1 %v968_v33 }
  0x32   :  { %415 = vmatmul.mubr.bf16.gmra.mxu0 %v959_v34 }
  0x33   :  { %422 = vmatprep.mubr.bf16.mxu0 %v962_v35 }
  0x34   :  { %918 = vmatmul.mubr.bf16.gmra.mxu1 %v969_v36 }
  0x35   :  { %921 = vmatprep.mubr.bf16.mxu1 %v975_v37 }
  0x3a   :  { %423 = vmatmul.mubr.bf16.gmra.mxu0 %v964_v38 }
  0x3b   :  { %430 = vmatprep.mubr.bf16.mxu0 %v965_v39 }
  0x3c   :  { %922 = vmatmul.mubr.bf16.gmra.mxu1 %v977_v40 }
  0x42   :  { %431 = vmatmul.mubr.bf16.gmra.mxu0 %v967_v41 }
  0x43   :  { %438 = vmatprep.mubr.bf16.mxu0 %v970_v42 }
  0x4a   :  { %439 = vmatmul.mubr.bf16.gmra.mxu0 %v972_v43 }
  0x4b   :  { %446 = vmatprep.mubr.bf16.mxu0 %v973_v44 }
  0x52   :  { %447 = vmatmul.mubr.bf16.gmra.mxu0 %v976_v45 }
  0x53   :  { %454 = vmatprep.mubr.bf16.mxu0 %v978_v46 }
  0x5a   :  { %455 = vmatmul.mubr.bf16.gmra.mxu0 %v980_v47 }
  0xe2   :  { %v829_v48 = vpop.f32.mrf.mxu0 }
  0xe4   :  { %v830_v49 = vpop.f32.mrf.mxu0  ;;  %v911_v50 = vpop.f32.mrf.mxu1 }
  0xe5   :  { %v831_v53 = vadd.f32 %v830_v49, %v829_v48 }
  0xe6   :  { %v832_v51 = vpop.f32.mrf.mxu0  ;;  %v497_v52 = vpop.f32.mrf.mxu1 }
  0xe7   :  { %v498_v59 = vadd.f32 %v831_v53, %v497_v52 }
  0xe8   :  { %v833_v54 = vpop.f32.mrf.mxu0  ;;  %v912_v55 = vpop.f32.mrf.mxu1 }
  0xe9   :  { %v834_v56 = vadd.f32 %v833_v54, %v832_v51  ;;  %v640_v38 = vmul.f32 %v498_v59, %v498_v59 }
  0xea   :  { %v835_v57 = vpop.f32.mrf.mxu0  ;;  %v500_v58 = vpop.f32.mrf.mxu1 }
  0xeb   :  { %v501_v60 = vadd.f32 %v834_v56, %v500_v58 }
  0xec   :  { %v836_v61 = vpop.f32.mrf.mxu0  ;;  %v915_v62 = vpop.f32.mrf.mxu1 }
  0xed   :  { %v769_v63 = vpack.c.bf16 %v501_v60, %v498_v59  ;;  %v837_v1 = vadd.f32 %v836_v61, %v835_v57  ;;  %v641_v34 = vmul.f32 %v501_v60, %v501_v60 }
  0xee   :  { %v838_v0 = vpop.f32.mrf.mxu0  ;;  %v513_v3 = vpop.f32.mrf.mxu1 }
  0xef   :  { %770 = vst [vmem:[%s1174_s2] sm:$0xff] %v769_v63   ;;  %v506_v6 = vadd.f32 %v911_v50, %v837_v1  ;;  %v656_v42 = vadd.f32 %v641_v34, %v640_v38 }
  0xf0   :  { %v839_v2 = vpop.f32.mrf.mxu0  ;;  %v916_v9 = vpop.f32.mrf.mxu1 }
  0xf1   :  { %v840_v4 = vadd.f32 %v839_v2, %v838_v0  ;;  %v642_v39 = vmul.f32 %v506_v6, %v506_v6 }
  0xf2   :  { %v841_v5 = vpop.f32.mrf.mxu0  ;;  %v516_v14 = vpop.f32.mrf.mxu1 }
  0xf3   :  { %v509_v7 = vadd.f32 %v912_v55, %v840_v4  ;;  %v657_v47 = vadd.f32 %v656_v42, %v642_v39 }
  0xf4   :  { %v842_v8 = vpop.f32.mrf.mxu0  ;;  %v919_v20 = vpop.f32.mrf.mxu1 }
  0xf5   :  { %v774_v10 = vpack.c.bf16 %v509_v7, %v506_v6  ;;  %v843_v12 = vadd.f32 %v842_v8, %v841_v5  ;;  %v643_v43 = vmul.f32 %v509_v7, %v509_v7 }
  0xf6   :  { %v844_v11 = vpop.f32.mrf.mxu0  ;;  %v529_v25 = vpop.f32.mrf.mxu1 }
  0xf7   :  { %806 = vst [vmem:[%s1174_s2 + $0x8] sm:$0xff] %v774_v10   ;;  %v514_v17 = vadd.f32 %v843_v12, %v513_v3  ;;  %v658_v52 = vadd.f32 %v657_v47, %v643_v43 }
  0xf8   :  { %v845_v13 = vpop.f32.mrf.mxu0  ;;  %v920_v31 = vpop.f32.mrf.mxu1 }
  0xf9   :  { %v846_v15 = vadd.f32 %v845_v13, %v844_v11  ;;  %v644_v48 = vmul.f32 %v514_v17, %v514_v17 }
  0xfa   :  { %v847_v16 = vpop.f32.mrf.mxu0  ;;  %v532_v37 = vpop.f32.mrf.mxu1 }
  0xfb   :  { %v517_v18 = vadd.f32 %v846_v15, %v516_v14  ;;  %v659_v56 = vadd.f32 %v658_v52, %v644_v48 }
  0xfc   :  { %v848_v19 = vpop.f32.mrf.mxu0  ;;  %v923_v51 = vpop.f32.mrf.mxu1 }
  0xfd   :  { %v779_v21 = vpack.c.bf16 %v517_v18, %v514_v17  ;;  %v849_v23 = vadd.f32 %v848_v19, %v847_v16  ;;  %v645_v53 = vmul.f32 %v517_v18, %v517_v18 }
  0xfe   :  { %v850_v22 = vpop.f32.mrf.mxu0  ;;  %v545_v60 = vpop.f32.mrf.mxu1 }
  0xff   :  { %807 = vst [vmem:[%s1174_s2 + $0x10] sm:$0xff] %v779_v21   ;;  %v522_v28 = vadd.f32 %v915_v62, %v849_v23  ;;  %v660_v61 = vadd.f32 %v659_v56, %v645_v53 }
 0x100   :  { %v851_v24 = vpop.f32.mrf.mxu0  ;;  %v924_v7 = vpop.f32.mrf.mxu1 }
 0x101   :  { %v852_v26 = vadd.f32 %v851_v24, %v850_v22  ;;  %v646_v57 = vmul.f32 %v522_v28, %v522_v28 }
 0x102   :  { %v853_v27 = vpop.f32.mrf.mxu0  ;;  %v548_v15 = vpop.f32.mrf.mxu1 }
 0x103   :  { %v525_v29 = vadd.f32 %v916_v9, %v852_v26  ;;  %v661_v2 = vadd.f32 %v660_v61, %v646_v57 }
 0x104   :  { %v854_v30 = vpop.f32.mrf.mxu0 }
 0x105   :  { %v784_v32 = vpack.c.bf16 %v525_v29, %v522_v28  ;;  %v855_v35 = vadd.f32 %v854_v30, %v853_v27  ;;  %v647_v62 = vmul.f32 %v525_v29, %v525_v29 }
 0x106   :  { %v856_v33 = vpop.f32.mrf.mxu0 }
 0x107   :  { %808 = vst [vmem:[%s1174_s2 + $0x18] sm:$0xff] %v784_v32   ;;  %v530_v44 = vadd.f32 %v855_v35, %v529_v25  ;;  %v662_v8 = vadd.f32 %v661_v2, %v647_v62 }
 0x108   :  { %v857_v36 = vpop.f32.mrf.mxu0 }
 0x109   :  { %v858_v40 = vadd.f32 %v857_v36, %v856_v33  ;;  %v648_v3 = vmul.f32 %v530_v44, %v530_v44 }
 0x10a   :  { %v859_v41 = vpop.f32.mrf.mxu0 }
 0x10b   :  { %v533_v45 = vadd.f32 %v858_v40, %v532_v37  ;;  %v663_v11 = vadd.f32 %v662_v8, %v648_v3 }
 0x10c   :  { %v860_v46 = vpop.f32.mrf.mxu0 }
 0x10d   :  { %v789_v49 = vpack.c.bf16 %v533_v45, %v530_v44  ;;  %v861_v54 = vadd.f32 %v860_v46, %v859_v41  ;;  %v649_v9 = vmul.f32 %v533_v45, %v533_v45 }
 0x10e   :  { %v862_v50 = vpop.f32.mrf.mxu0 }
 0x10f   :  { %809 = vst [vmem:[%s1174_s2 + $0x20] sm:$0xff] %v789_v49   ;;  %v538_v63 = vadd.f32 %v919_v20, %v861_v54  ;;  %v664_v17 = vadd.f32 %v663_v11, %v649_v9 }
 0x110   :  { %v863_v55 = vpop.f32.mrf.mxu0 }
 0x111   :  { %v864_v58 = vadd.f32 %v863_v55, %v862_v50  ;;  %v650_v12 = vmul.f32 %v538_v63, %v538_v63 }
 0x112   :  { %v865_v59 = vpop.f32.mrf.mxu0 }
 0x113   :  { %v541_v0 = vadd.f32 %v920_v31, %v864_v58  ;;  %v665_v21 = vadd.f32 %v664_v17, %v650_v12 }
 0x114   :  { %v866_v1 = vpop.f32.mrf.mxu0 }
 0x115   :  { %v794_v4 = vpack.c.bf16 %v541_v0, %v538_v63  ;;  %v867_v5 = vadd.f32 %v866_v1, %v865_v59  ;;  %v651_v18 = vmul.f32 %v541_v0, %v541_v0 }
 0x116   :  { %v868_v6 = vpop.f32.mrf.mxu0 }
 0x117   :  { %810 = vst [vmem:[%s1174_s2 + $0x28] sm:$0xff] %v794_v4   ;;  %v546_v13 = vadd.f32 %v867_v5, %v545_v60  ;;  %v666_v26 = vadd.f32 %v665_v21, %v651_v18 }
 0x118   :  { %v869_v10 = vpop.f32.mrf.mxu0 }
 0x119   :  { %v870_v14 = vadd.f32 %v869_v10, %v868_v6  ;;  %v652_v22 = vmul.f32 %v546_v13, %v546_v13 }
 0x11a   :  { %v871_v16 = vpop.f32.mrf.mxu0 }
 0x11b   :  { %v549_v19 = vadd.f32 %v870_v14, %v548_v15  ;;  %v667_v30 = vadd.f32 %v666_v26, %v652_v22 }
 0x11c   :  { %v872_v20 = vpop.f32.mrf.mxu0 }
 0x11d   :  { %v799_v23 = vpack.c.bf16 %v549_v19, %v546_v13  ;;  %v873_v24 = vadd.f32 %v872_v20, %v871_v16  ;;  %v653_v27 = vmul.f32 %v549_v19, %v549_v19 }
 0x11e   :  { %v874_v25 = vpop.f32.mrf.mxu0 }
 0x11f   :  { %811 = vst [vmem:[%s1174_s2 + $0x30] sm:$0xff] %v799_v23   ;;  %v554_v28 = vadd.f32 %v923_v51, %v873_v24  ;;  %v668_v33 = vadd.f32 %v667_v30, %v653_v27 }
 0x120   :  { %v875_v29 = vpop.f32.mrf.mxu0 }
 0x121   :  { %v654_v31 = vmul.f32 %v554_v28, %v554_v28  ;;  %v876_v32 = vadd.f32 %v875_v29, %v874_v25 }
 0x123   :  { %v557_v34 = vadd.f32 %v924_v7, %v876_v32  ;;  %v669_v35 = vadd.f32 %v668_v33, %v654_v31 }
 0x125   :  { %v804_v36 = vpack.c.bf16 %v557_v34, %v554_v28  ;;  %v655_v37 = vmul.f32 %v557_v34, %v557_v34 }
 0x127   :  { %812 = vst [vmem:[%s1174_s2 + $0x38] sm:$0xff] %v804_v36   ;;  %v670_v38 = vadd.f32 %v669_v35, %v655_v37 }
 0x129   :  { %v671_v39 = vrot.slane %v670_v38, 4 }
 0x12b   :  { %v672_v40 = vadd.f32 %v671_v39, %v670_v38 }
 0x12d   :  { %v673_v41 = vrot.slane %v672_v40, 2 }
 0x12f   :  { %v674_v42 = vadd.f32 %v673_v41, %v672_v40 }
 0x131   :  { %v675_v43 = vrot.slane %v674_v42, 1 }
 0x133   :  { %v676_v44 = vadd.f32 %v675_v43, %v674_v42 }
 0x135   :  { %677 = vst [vmem:[%s1175_s3] sm:$0x1] %v676_v44 }

// kernel: generator_forward.7
= control target key start
LH: loop header
LB: loop body
LE: loop exit
PB: predicated region body
PF: predicated region fallthrough
CT: control target
= control target key end

     0   :  { %s1120_s1 = inlined_call_operand.vmem [shape: bf16[256,128], index: 1, kind: input, shape index: {}]   ;;  %s1121_s0 = inlined_call_operand.vmem [shape: bf16[256,256], index: 0, kind: input, shape index: {}]   ;;  %s1122_s2 = inlined_call_operand.vmem [shape: f32[256,128], index: 2, kind: output, shape index: {}]  }
   0x1   :  { %v737_v0 = vld [vmem:[%s1120_s1 + $0x78] sm:$0xff]   ;;  %v739_v2 = vld [vmem:[%s1120_s1 + $0x70] sm:$0xff]   ;;  %v741_v4 = vld [vmem:[%s1120_s1 + $0x68] sm:$0xff]  }
   0x2   :  { %v738_v1 = vld [vmem:[%s1120_s1 + $0x38] sm:$0xff]   ;;  %609 = vmatprep.subr.bf16.mxu0 %v737_v0  ;;  %721 = vmatprep.subr.bf16.mxu1 %v737_v0  ;;  %v740_v3 = vld [vmem:[%s1120_s1 + $0x30] sm:$0xff]   ;;  %v742_v5 = vld [vmem:[%s1120_s1 + $0x28] sm:$0xff]  }
   0x3   :  { %610 = vmatpush3.bf16.msra.mxu0 %v738_v1  ;;  %729 = vmatpush3.bf16.msra.mxu1 %v738_v1  ;;  %v743_v6 = vld [vmem:[%s1120_s1 + $0x60] sm:$0xff]   ;;  %v745_v8 = vld [vmem:[%s1120_s1 + $0x58] sm:$0xff]   ;;  %v747_v10 = vld [vmem:[%s1120_s1 + $0x50] sm:$0xff]  }
   0x4   :  { %611 = vmatprep.subr.bf16.mxu0 %v739_v2  ;;  %722 = vmatprep.subr.bf16.mxu1 %v739_v2  ;;  %v744_v7 = vld [vmem:[%s1120_s1 + $0x20] sm:$0xff]   ;;  %v746_v9 = vld [vmem:[%s1120_s1 + $0x18] sm:$0xff]   ;;  %v748_v13 = vld [vmem:[%s1120_s1 + $0x10] sm:$0xff]  }
   0x5   :  { %v755_v11 = vld [vmem:[%s1121_s0 + $0x4] ss:$8 sps:$4 sm:$0xff]   ;;  %v753_v18 = vld [vmem:[%s1121_s0] ss:$8 sps:$4 sm:$0xff]   ;;  %v759_v20 = vld [vmem:[%s1121_s0 + $0x14] ss:$8 sps:$4 sm:$0xff]  }
   0x6   :  { %v758_v12 = vld [vmem:[%s1121_s0 + $0x84] ss:$8 sps:$4 sm:$0xff]   ;;  %364 = vmatprep.mubr.bf16.mxu0 %v755_v11  ;;  %v756_v19 = vld [vmem:[%s1121_s0 + $0x80] ss:$8 sps:$4 sm:$0xff]   ;;  %v761_v21 = vld [vmem:[%s1121_s0 + $0x94] ss:$8 sps:$4 sm:$0xff]  }
   0x7   :  { %612 = vmatpush3.bf16.msra.mxu0 %v740_v3  ;;  %730 = vmatpush3.bf16.msra.mxu1 %v740_v3  ;;  %v749_v14 = vld [vmem:[%s1120_s1 + $0x48] sm:$0xff]   ;;  %v751_v16 = vld [vmem:[%s1120_s1 + $0x40] sm:$0xff]   ;;  %v763_v22 = vld [vmem:[%s1121_s0 + $0x10] ss:$8 sps:$4 sm:$0xff]  }
   0x8   :  { %613 = vmatprep.subr.bf16.mxu0 %v741_v4  ;;  %723 = vmatprep.subr.bf16.mxu1 %v741_v4  ;;  %v750_v15 = vld [vmem:[%s1120_s1 + $0x8] sm:$0xff]   ;;  %v752_v17 = vld [vmem:[%s1120_s1] sm:$0xff]   ;;  %v764_v23 = vld [vmem:[%s1121_s0 + $0x90] ss:$8 sps:$4 sm:$0xff]  }
   0x9   :  { %428 = vmatprep.mubr.bf16.mxu1 %v758_v12  ;;  %v765_v24 = vld [vmem:[%s1121_s0 + $0x24] ss:$8 sps:$4 sm:$0xff]   ;;  %v769_v26 = vld [vmem:[%s1121_s0 + $0x20] ss:$8 sps:$4 sm:$0xff]   ;;  %v771_v28 = vld [vmem:[%s1121_s0 + $0x34] ss:$8 sps:$4 sm:$0xff]  }
   0xa   :  { %v767_v25 = vld [vmem:[%s1121_s0 + $0xa4] ss:$8 sps:$4 sm:$0xff]   ;;  %v770_v27 = vld [vmem:[%s1121_s0 + $0xa0] ss:$8 sps:$4 sm:$0xff]   ;;  %v773_v29 = vld [vmem:[%s1121_s0 + $0xb4] ss:$8 sps:$4 sm:$0xff]  }
   0xb   :  { %614 = vmatpush3.bf16.msra.mxu0 %v742_v5  ;;  %731 = vmatpush3.bf16.msra.mxu1 %v742_v5  ;;  %v775_v30 = vld [vmem:[%s1121_s0 + $0x30] ss:$8 sps:$4 sm:$0xff]   ;;  %v777_v32 = vld [vmem:[%s1121_s0 + $0x44] ss:$8 sps:$4 sm:$0xff]   ;;  %v781_v34 = vld [vmem:[%s1121_s0 + $0x40] ss:$8 sps:$4 sm:$0xff]  }
   0xc   :  { %615 = vmatprep.subr.bf16.mxu0 %v743_v6  ;;  %724 = vmatprep.subr.bf16.mxu1 %v743_v6  ;;  %v776_v31 = vld [vmem:[%s1121_s0 + $0xb0] ss:$8 sps:$4 sm:$0xff]   ;;  %v779_v33 = vld [vmem:[%s1121_s0 + $0xc4] ss:$8 sps:$4 sm:$0xff]   ;;  %v782_v35 = vld [vmem:[%s1121_s0 + $0xc0] ss:$8 sps:$4 sm:$0xff]  }
   0xd   :  { %v783_v36 = vld [vmem:[%s1121_s0 + $0x54] ss:$8 sps:$4 sm:$0xff]   ;;  %v787_v38 = vld [vmem:[%s1121_s0 + $0x50] ss:$8 sps:$4 sm:$0xff]   ;;  %v789_v40 = vld [vmem:[%s1121_s0 + $0x64] ss:$8 sps:$4 sm:$0xff]  }
   0xe   :  { %v785_v37 = vld [vmem:[%s1121_s0 + $0xd4] ss:$8 sps:$4 sm:$0xff]   ;;  %v788_v39 = vld [vmem:[%s1121_s0 + $0xd0] ss:$8 sps:$4 sm:$0xff]   ;;  %v791_v41 = vld [vmem:[%s1121_s0 + $0xe4] ss:$8 sps:$4 sm:$0xff]  }
   0xf   :  { %616 = vmatpush3.bf16.msra.mxu0 %v744_v7  ;;  %732 = vmatpush3.bf16.msra.mxu1 %v744_v7  ;;  %v793_v42 = vld [vmem:[%s1121_s0 + $0x60] ss:$8 sps:$4 sm:$0xff]   ;;  %v795_v44 = vld [vmem:[%s1121_s0 + $0x74] ss:$8 sps:$4 sm:$0xff]   ;;  %v799_v46 = vld [vmem:[%s1121_s0 + $0x70] ss:$8 sps:$4 sm:$0xff]  }
  0x10   :  { %617 = vmatprep.subr.bf16.mxu0 %v745_v8  ;;  %725 = vmatprep.subr.bf16.mxu1 %v745_v8  ;;  %v794_v43 = vld [vmem:[%s1121_s0 + $0xe0] ss:$8 sps:$4 sm:$0xff]   ;;  %v797_v45 = vld [vmem:[%s1121_s0 + $0xf4] ss:$8 sps:$4 sm:$0xff]   ;;  %v800_v47 = vld [vmem:[%s1121_s0 + $0xf0] ss:$8 sps:$4 sm:$0xff]  }
  0x13   :  { %618 = vmatpush3.bf16.msra.mxu0 %v746_v9  ;;  %733 = vmatpush3.bf16.msra.mxu1 %v746_v9 }
  0x14   :  { %619 = vmatprep.subr.bf16.mxu0 %v747_v10  ;;  %726 = vmatprep.subr.bf16.mxu1 %v747_v10 }
  0x17   :  { %620 = vmatpush3.bf16.msra.mxu0 %v748_v13  ;;  %734 = vmatpush3.bf16.msra.mxu1 %v748_v13 }
  0x18   :  { %621 = vmatprep.subr.bf16.mxu0 %v749_v14  ;;  %727 = vmatprep.subr.bf16.mxu1 %v749_v14 }
  0x1b   :  { %622 = vmatpush3.bf16.msra.mxu0 %v750_v15  ;;  %735 = vmatpush3.bf16.msra.mxu1 %v750_v15 }
  0x1c   :  { %623 = vmatprep.subr.bf16.mxu0 %v751_v16  ;;  %728 = vmatprep.subr.bf16.mxu1 %v751_v16 }
  0x1f   :  { %624 = vmatpush3.bf16.msra.mxu0 %v752_v17  ;;  %736 = vmatpush3.bf16.msra.mxu1 %v752_v17 }
  0x22   :  { %365 = vmatmul.mubr.bf16.vlgmr.msra.gmra.mxu0 %v753_v18  ;;  %429 = vmatmul.mubr.bf16.vlgmr.msra.gmra.mxu1 %v756_v19 }
  0x23   :  { %372 = vmatprep.mubr.bf16.mxu0 %v759_v20  ;;  %436 = vmatprep.mubr.bf16.mxu1 %v761_v21 }
  0x2a   :  { %373 = vmatmul.mubr.bf16.gmra.mxu0 %v763_v22  ;;  %437 = vmatmul.mubr.bf16.gmra.mxu1 %v764_v23 }
  0x2b   :  { %380 = vmatprep.mubr.bf16.mxu0 %v765_v24  ;;  %444 = vmatprep.mubr.bf16.mxu1 %v767_v25 }
  0x32   :  { %381 = vmatmul.mubr.bf16.gmra.mxu0 %v769_v26  ;;  %445 = vmatmul.mubr.bf16.gmra.mxu1 %v770_v27 }
  0x33   :  { %388 = vmatprep.mubr.bf16.mxu0 %v771_v28  ;;  %452 = vmatprep.mubr.bf16.mxu1 %v773_v29 }
  0x3a   :  { %389 = vmatmul.mubr.bf16.gmra.mxu0 %v775_v30  ;;  %453 = vmatmul.mubr.bf16.gmra.mxu1 %v776_v31 }
  0x3b   :  { %396 = vmatprep.mubr.bf16.mxu0 %v777_v32  ;;  %460 = vmatprep.mubr.bf16.mxu1 %v779_v33 }
  0x42   :  { %397 = vmatmul.mubr.bf16.gmra.mxu0 %v781_v34  ;;  %461 = vmatmul.mubr.bf16.gmra.mxu1 %v782_v35 }
  0x43   :  { %404 = vmatprep.mubr.bf16.mxu0 %v783_v36  ;;  %468 = vmatprep.mubr.bf16.mxu1 %v785_v37 }
  0x4a   :  { %405 = vmatmul.mubr.bf16.gmra.mxu0 %v787_v38  ;;  %469 = vmatmul.mubr.bf16.gmra.mxu1 %v788_v39 }
  0x4b   :  { %412 = vmatprep.mubr.bf16.mxu0 %v789_v40  ;;  %476 = vmatprep.mubr.bf16.mxu1 %v791_v41 }
  0x52   :  { %413 = vmatmul.mubr.bf16.gmra.mxu0 %v793_v42  ;;  %477 = vmatmul.mubr.bf16.gmra.mxu1 %v794_v43 }
  0x53   :  { %420 = vmatprep.mubr.bf16.mxu0 %v795_v44  ;;  %484 = vmatprep.mubr.bf16.mxu1 %v797_v45 }
  0x5a   :  { %421 = vmatmul.mubr.bf16.gmra.mxu0 %v799_v46  ;;  %485 = vmatmul.mubr.bf16.gmra.mxu1 %v800_v47 }
  0xe2   :  { %v625_v48 = vpop.f32.mrf.mxu0  ;;  %v673_v49 = vpop.f32.mrf.mxu1 }
  0xe4   :  { %v626_v50 = vpop.f32.mrf.mxu0  ;;  %v674_v51 = vpop.f32.mrf.mxu1 }
  0xe5   :  { %v627_v52 = vadd.f32 %v626_v50, %v625_v48  ;;  %v675_v53 = vadd.f32 %v674_v51, %v673_v49 }
  0xe6   :  { %v628_v54 = vpop.f32.mrf.mxu0  ;;  %v676_v55 = vpop.f32.mrf.mxu1 }
  0xe7   :  { %801 = vtanh.f32 %v627_v52 }
  0xe8   :  { %803 = vtanh.f32 %v675_v53  ;;  %v629_v56 = vpop.f32.mrf.mxu0  ;;  %v677_v57 = vpop.f32.mrf.mxu1 }
  0xe9   :  { %v630_v58 = vadd.f32 %v629_v56, %v628_v54  ;;  %v678_v59 = vadd.f32 %v677_v57, %v676_v55 }
  0xea   :  { %v631_v60 = vpop.f32.mrf.mxu0  ;;  %v679_v61 = vpop.f32.mrf.mxu1 }
  0xeb   :  { %805 = vtanh.f32 %v630_v58 }
  0xec   :  { %807 = vtanh.f32 %v678_v59  ;;  %v632_v62 = vpop.f32.mrf.mxu0  ;;  %v680_v63 = vpop.f32.mrf.mxu1 }
  0xed   :  { %v633_v0 = vadd.f32 %v632_v62, %v631_v60  ;;  %v681_v1 = vadd.f32 %v680_v63, %v679_v61 }
  0xee   :  { %v634_v2 = vpop.f32.mrf.mxu0  ;;  %v682_v3 = vpop.f32.mrf.mxu1 }
  0xef   :  { %809 = vtanh.f32 %v633_v0 }
  0xf0   :  { %811 = vtanh.f32 %v681_v1  ;;  %v635_v4 = vpop.f32.mrf.mxu0  ;;  %v683_v5 = vpop.f32.mrf.mxu1 }
  0xf1   :  { %v636_v6 = vadd.f32 %v635_v4, %v634_v2  ;;  %v684_v7 = vadd.f32 %v683_v5, %v682_v3 }
  0xf2   :  { %v637_v8 = vpop.f32.mrf.mxu0  ;;  %v685_v9 = vpop.f32.mrf.mxu1 }
  0xf3   :  { %813 = vtanh.f32 %v636_v6 }
  0xf4   :  { %v802_v10 = vpop.eup %801  ;;  %815 = vtanh.f32 %v684_v7  ;;  %v638_v11 = vpop.f32.mrf.mxu0 }
  0xf5   :  { %v686_v12 = vpop.f32.mrf.mxu1  ;;  %v804_v13 = vpop.eup %803  ;;  %525 = vst [vmem:[%s1122_s2] sm:$0xff] %v802_v10  ;;  %v639_v14 = vadd.f32 %v638_v11, %v637_v8 }
  0xf6   :  { %v687_v15 = vadd.f32 %v686_v12, %v685_v9  ;;  %541 = vst [vmem:[%s1122_s2 + $0x80] sm:$0xff] %v804_v13  ;;  %v640_v16 = vpop.f32.mrf.mxu0 }
  0xf7   :  { %v688_v17 = vpop.f32.mrf.mxu1  ;;  %817 = vtanh.f32 %v639_v14 }
  0xf8   :  { %v806_v18 = vpop.eup %805  ;;  %819 = vtanh.f32 %v687_v15  ;;  %v641_v19 = vpop.f32.mrf.mxu0 }
  0xf9   :  { %v689_v20 = vpop.f32.mrf.mxu1  ;;  %v808_v21 = vpop.eup %807  ;;  %526 = vst [vmem:[%s1122_s2 + $0x8] sm:$0xff] %v806_v18  ;;  %v642_v22 = vadd.f32 %v641_v19, %v640_v16 }
  0xfa   :  { %v690_v23 = vadd.f32 %v689_v20, %v688_v17  ;;  %542 = vst [vmem:[%s1122_s2 + $0x88] sm:$0xff] %v808_v21  ;;  %v643_v24 = vpop.f32.mrf.mxu0 }
  0xfb   :  { %v691_v25 = vpop.f32.mrf.mxu1  ;;  %821 = vtanh.f32 %v642_v22 }
  0xfc   :  { %v810_v26 = vpop.eup %809  ;;  %823 = vtanh.f32 %v690_v23  ;;  %v644_v27 = vpop.f32.mrf.mxu0 }
  0xfd   :  { %v692_v28 = vpop.f32.mrf.mxu1  ;;  %v812_v29 = vpop.eup %811  ;;  %527 = vst [vmem:[%s1122_s2 + $0x10] sm:$0xff] %v810_v26  ;;  %v645_v30 = vadd.f32 %v644_v27, %v643_v24 }
  0xfe   :  { %v693_v31 = vadd.f32 %v692_v28, %v691_v25  ;;  %543 = vst [vmem:[%s1122_s2 + $0x90] sm:$0xff] %v812_v29  ;;  %v646_v32 = vpop.f32.mrf.mxu0 }
  0xff   :  { %v694_v33 = vpop.f32.mrf.mxu1  ;;  %825 = vtanh.f32 %v645_v30 }
 0x100   :  { %v814_v34 = vpop.eup %813  ;;  %827 = vtanh.f32 %v693_v31  ;;  %v647_v35 = vpop.f32.mrf.mxu0 }
 0x101   :  { %v695_v36 = vpop.f32.mrf.mxu1  ;;  %v816_v37 = vpop.eup %815  ;;  %528 = vst [vmem:[%s1122_s2 + $0x18] sm:$0xff] %v814_v34  ;;  %v648_v38 = vadd.f32 %v647_v35, %v646_v32 }
 0x102   :  { %v696_v39 = vadd.f32 %v695_v36, %v694_v33  ;;  %544 = vst [vmem:[%s1122_s2 + $0x98] sm:$0xff] %v816_v37  ;;  %v649_v40 = vpop.f32.mrf.mxu0 }
 0x103   :  { %v697_v41 = vpop.f32.mrf.mxu1  ;;  %829 = vtanh.f32 %v648_v38 }
 0x104   :  { %v818_v42 = vpop.eup %817  ;;  %831 = vtanh.f32 %v696_v39  ;;  %v650_v43 = vpop.f32.mrf.mxu0 }
 0x105   :  { %v698_v44 = vpop.f32.mrf.mxu1  ;;  %v820_v45 = vpop.eup %819  ;;  %529 = vst [vmem:[%s1122_s2 + $0x20] sm:$0xff] %v818_v42  ;;  %v651_v46 = vadd.f32 %v650_v43, %v649_v40 }
 0x106   :  { %v699_v47 = vadd.f32 %v698_v44, %v697_v41  ;;  %545 = vst [vmem:[%s1122_s2 + $0xa0] sm:$0xff] %v820_v45  ;;  %v652_v48 = vpop.f32.mrf.mxu0 }
 0x107   :  { %v700_v49 = vpop.f32.mrf.mxu1  ;;  %833 = vtanh.f32 %v651_v46 }
 0x108   :  { %v822_v50 = vpop.eup %821  ;;  %835 = vtanh.f32 %v699_v47  ;;  %v653_v51 = vpop.f32.mrf.mxu0 }
 0x109   :  { %v701_v52 = vpop.f32.mrf.mxu1  ;;  %v824_v53 = vpop.eup %823  ;;  %530 = vst [vmem:[%s1122_s2 + $0x28] sm:$0xff] %v822_v50  ;;  %v654_v54 = vadd.f32 %v653_v51, %v652_v48 }
 0x10a   :  { %v702_v55 = vadd.f32 %v701_v52, %v700_v49  ;;  %546 = vst [vmem:[%s1122_s2 + $0xa8] sm:$0xff] %v824_v53  ;;  %v655_v56 = vpop.f32.mrf.mxu0 }
 0x10b   :  { %v703_v57 = vpop.f32.mrf.mxu1  ;;  %837 = vtanh.f32 %v654_v54 }
 0x10c   :  { %v826_v58 = vpop.eup %825  ;;  %839 = vtanh.f32 %v702_v55  ;;  %v656_v59 = vpop.f32.mrf.mxu0 }
 0x10d   :  { %v704_v60 = vpop.f32.mrf.mxu1  ;;  %v828_v61 = vpop.eup %827  ;;  %531 = vst [vmem:[%s1122_s2 + $0x30] sm:$0xff] %v826_v58  ;;  %v657_v62 = vadd.f32 %v656_v59, %v655_v56 }
 0x10e   :  { %v705_v63 = vadd.f32 %v704_v60, %v703_v57  ;;  %547 = vst [vmem:[%s1122_s2 + $0xb0] sm:$0xff] %v828_v61  ;;  %v658_v0 = vpop.f32.mrf.mxu0 }
 0x10f   :  { %v706_v1 = vpop.f32.mrf.mxu1  ;;  %841 = vtanh.f32 %v657_v62 }
 0x110   :  { %v830_v2 = vpop.eup %829  ;;  %843 = vtanh.f32 %v705_v63  ;;  %v659_v3 = vpop.f32.mrf.mxu0 }
 0x111   :  { %v707_v4 = vpop.f32.mrf.mxu1  ;;  %v832_v5 = vpop.eup %831  ;;  %532 = vst [vmem:[%s1122_s2 + $0x38] sm:$0xff] %v830_v2  ;;  %v660_v6 = vadd.f32 %v659_v3, %v658_v0 }
 0x112   :  { %v708_v7 = vadd.f32 %v707_v4, %v706_v1  ;;  %548 = vst [vmem:[%s1122_s2 + $0xb8] sm:$0xff] %v832_v5  ;;  %v661_v8 = vpop.f32.mrf.mxu0 }
 0x113   :  { %v709_v9 = vpop.f32.mrf.mxu1  ;;  %845 = vtanh.f32 %v660_v6 }
 0x114   :  { %v834_v10 = vpop.eup %833  ;;  %847 = vtanh.f32 %v708_v7  ;;  %v662_v11 = vpop.f32.mrf.mxu0 }
 0x115   :  { %v710_v12 = vpop.f32.mrf.mxu1  ;;  %v836_v13 = vpop.eup %835  ;;  %533 = vst [vmem:[%s1122_s2 + $0x40] sm:$0xff] %v834_v10  ;;  %v663_v14 = vadd.f32 %v662_v11, %v661_v8 }
 0x116   :  { %v711_v15 = vadd.f32 %v710_v12, %v709_v9  ;;  %549 = vst [vmem:[%s1122_s2 + $0xc0] sm:$0xff] %v836_v13  ;;  %v664_v16 = vpop.f32.mrf.mxu0 }
 0x117   :  { %v712_v17 = vpop.f32.mrf.mxu1  ;;  %849 = vtanh.f32 %v663_v14 }
 0x118   :  { %v838_v18 = vpop.eup %837  ;;  %851 = vtanh.f32 %v711_v15  ;;  %v665_v19 = vpop.f32.mrf.mxu0 }
 0x119   :  { %v713_v20 = vpop.f32.mrf.mxu1  ;;  %v840_v21 = vpop.eup %839  ;;  %534 = vst [vmem:[%s1122_s2 + $0x48] sm:$0xff] %v838_v18  ;;  %v666_v22 = vadd.f32 %v665_v19, %v664_v16 }
 0x11a   :  { %v714_v23 = vadd.f32 %v713_v20, %v712_v17  ;;  %550 = vst [vmem:[%s1122_s2 + $0xc8] sm:$0xff] %v840_v21  ;;  %v667_v24 = vpop.f32.mrf.mxu0 }
 0x11b   :  { %v715_v25 = vpop.f32.mrf.mxu1  ;;  %853 = vtanh.f32 %v666_v22 }
 0x11c   :  { %v842_v26 = vpop.eup %841  ;;  %855 = vtanh.f32 %v714_v23  ;;  %v668_v27 = vpop.f32.mrf.mxu0 }
 0x11d   :  { %v716_v28 = vpop.f32.mrf.mxu1  ;;  %v844_v29 = vpop.eup %843  ;;  %535 = vst [vmem:[%s1122_s2 + $0x50] sm:$0xff] %v842_v26  ;;  %v669_v30 = vadd.f32 %v668_v27, %v667_v24 }
 0x11e   :  { %v717_v31 = vadd.f32 %v716_v28, %v715_v25  ;;  %551 = vst [vmem:[%s1122_s2 + $0xd0] sm:$0xff] %v844_v29  ;;  %v670_v32 = vpop.f32.mrf.mxu0 }
 0x11f   :  { %v718_v33 = vpop.f32.mrf.mxu1  ;;  %857 = vtanh.f32 %v669_v30 }
 0x120   :  { %v846_v34 = vpop.eup %845  ;;  %859 = vtanh.f32 %v717_v31  ;;  %v671_v35 = vpop.f32.mrf.mxu0 }
 0x121   :  { %v719_v36 = vpop.f32.mrf.mxu1  ;;  %v848_v37 = vpop.eup %847  ;;  %536 = vst [vmem:[%s1122_s2 + $0x58] sm:$0xff] %v846_v34  ;;  %v672_v38 = vadd.f32 %v671_v35, %v670_v32 }
 0x122   :  { %v720_v39 = vadd.f32 %v719_v36, %v718_v33  ;;  %552 = vst [vmem:[%s1122_s2 + $0xd8] sm:$0xff] %v848_v37 }
 0x123   :  { %861 = vtanh.f32 %v672_v38 }
 0x124   :  { %v850_v40 = vpop.eup %849  ;;  %863 = vtanh.f32 %v720_v39 }
 0x125   :  { %v852_v41 = vpop.eup %851  ;;  %537 = vst [vmem:[%s1122_s2 + $0x60] sm:$0xff] %v850_v40 }
 0x126   :  { %553 = vst [vmem:[%s1122_s2 + $0xe0] sm:$0xff] %v852_v41 }
 0x128   :  { %v854_v42 = vpop.eup %853 }
 0x129   :  { %v856_v43 = vpop.eup %855  ;;  %538 = vst [vmem:[%s1122_s2 + $0x68] sm:$0xff] %v854_v42 }
 0x12a   :  { %554 = vst [vmem:[%s1122_s2 + $0xe8] sm:$0xff] %v856_v43 }
 0x12c   :  { %v858_v44 = vpop.eup %857 }
 0x12d   :  { %v860_v45 = vpop.eup %859  ;;  %539 = vst [vmem:[%s1122_s2 + $0x70] sm:$0xff] %v858_v44 }
 0x12e   :  { %555 = vst [vmem:[%s1122_s2 + $0xf0] sm:$0xff] %v860_v45 }
 0x130   :  { %v862_v46 = vpop.eup %861 }
 0x131   :  { %v864_v47 = vpop.eup %863  ;;  %540 = vst [vmem:[%s1122_s2 + $0x78] sm:$0xff] %v862_v46 }
 0x132   :  { %556 = vst [vmem:[%s1122_s2 + $0xf8] sm:$0xff] %v864_v47 }

</bundles_post_ra>
